<compile_context>
chip_gen: v6e
topology: v6e:2x2x1
jax: 0.10.0
libtpu: 0.0.40
codegen_flags: <defaults>
</compile_context>

<pallas_src>
import math
import numpy as np

import jax
import jax.numpy as jnp
from jax.experimental import pallas as pl
from jax.experimental.pallas import tpu as pltpu

NEG_INF = -1e18          # masked_fill value used by the reference MultiHeadAttention
F32 = jnp.float32
BF16 = jnp.bfloat16

PER_LAYER_KEYS = ["ln_g", "ln_b", "wqkv_s", "wo_s", "wq_c", "wkv_c", "wo_c",
                  "c1w", "c1b", "c2w", "c2b"]


def _round_up(x, m):
    return ((x + m - 1) // m) * m


# ----------------------------------------------------------------------------
# Per-example math (pure jnp) -- shared by the Pallas kernel body and by the
# plain-JAX reference used for the correctness check.
# ----------------------------------------------------------------------------
def _layer_norm(x, g, b, eps=1e-6):
    """Custom LayerNorm: gamma * (x - mean) / (std + eps) + beta (torch unbiased std)."""
    h = x.shape[-1]
    mean = jnp.mean(x, axis=-1, keepdims=True)
    var = jnp.sum((x - mean) ** 2, axis=-1, keepdims=True) / (h - 1)
    return g * (x - mean) / (jnp.sqrt(var) + eps) + b


def _split_heads(t, nh, d):
    """(L, nh*d) -> (nh, L, d): head-major stack of lane slices of a wide projection."""
    return jnp.concatenate([t[:, h * d:(h + 1) * d][None] for h in range(nh)], axis=0)


def _merge_heads(t):
    """(nh, L, d) -> (L, nh*d)."""
    return jnp.concatenate([t[h] for h in range(t.shape[0])], axis=-1)


def _mha(q, k, v, bias, wo, *, nh, want_attn, recip):
    """Multi-head attention core.

    q (Lq, K) f32 (1/sqrt(dk) scale already folded into the Q weights), k (Lk, K),
    v (Lk, V), bias additive mask broadcastable to (nh, Lq, Lk) (NEG_INF where
    masked), wo (V, H) bf16 merged-head output projection.
    Returns (out (Lq, H) f32, attn (Lq, Lk) f32 or None).  attn follows MoEL
    common.py: head-mean of the *masked pre-softmax logits*.
    """
    K = q.shape[-1]
    V = v.shape[-1]
    dk, dv = K // nh, V // nh

    qh = _split_heads(q.astype(BF16), nh, dk)                    # (nh, Lq, dk)
    kh = _split_heads(k.astype(BF16), nh, dk)                    # (nh, Lk, dk)
    vh = _split_heads(v.astype(BF16), nh, dv)                    # (nh, Lk, dv)

    logits = jnp.einsum('hqd,hkd->hqk', qh, kh,
                        preferred_element_type=F32) + bias       # (nh, Lq, Lk)
    m = jnp.max(logits, axis=-1, keepdims=True)
    p = jnp.exp(logits - m)
    w = p * recip(jnp.sum(p, axis=-1, keepdims=True))            # softmax
    ctx = jnp.einsum('hqk,hkd->hqd', w.astype(BF16), vh,
                     preferred_element_type=F32)                 # (nh, Lq, dv)
    # merged-head output projection: ONE (Lq, V) x (V, H) matmul
    out = jnp.dot(_merge_heads(ctx).astype(BF16), wo, preferred_element_type=F32)
    attn = jnp.sum(logits, axis=0) * (1.0 / nh) if want_attn else None
    return out, attn


def _shift_down(x, n):
    """out[t] = x[t - n] (zeros for t < n); static pad + slice along the sublane axis."""
    L = x.shape[0]
    pad = jnp.zeros((n, x.shape[1]), x.dtype)
    return jnp.concatenate([pad, x[:L - n]], axis=0)


def _causal_conv(x, w_taps, bias):
    """Causal Conv1d(kernel=3, left pad 2) as three accumulating K-aligned matmuls.

    w_taps: (3, Cin, Cout) bf16; tap 0 multiplies x[t-2], tap 1 x[t-1], tap 2 x[t].
    """
    xb = x.astype(BF16)
    y = jnp.dot(xb, w_taps[2], preferred_element_type=F32)
    y = y + jnp.dot(_shift_down(xb, 1), w_taps[1], preferred_element_type=F32)
    y = y + jnp.dot(_shift_down(xb, 2), w_taps[0], preferred_element_type=F32)
    return y + bias


def _decoder_layer(x, enc, dec_bias, src_bias, wp, *, nh, recip):
    """One DecoderLayer (pre-LN).  x (L, H) f32, enc (Ls, H) f32,
    dec_bias (L, L) / src_bias (1, Ls) additive NEG_INF masks."""
    K = wp["wq_c"].shape[-1]       # total key depth
    V = wp["wo_c"].shape[0]        # total value depth

    # --- masked multi-head self-attention: ONE wide fused QKV projection ---
    xn = _layer_norm(x, wp["ln_g"][0], wp["ln_b"][0])
    qkv = jnp.dot(xn.astype(BF16), wp["wqkv_s"], preferred_element_type=F32)   # (L, 2K+V)
    y, _ = _mha(qkv[:, :K], qkv[:, K:2 * K], qkv[:, 2 * K:], dec_bias[None],
                wp["wo_s"], nh=nh, want_attn=False, recip=recip)
    x = x + y                                           # dropout(p=0) == identity

    # --- encoder-decoder attention: wide Q and fused KV projections ---
    xn = _layer_norm(x, wp["ln_g"][1], wp["ln_b"][1])
    q = jnp.dot(xn.astype(BF16), wp["wq_c"], preferred_element_type=F32)       # (L, K)
    kv = jnp.dot(enc.astype(BF16), wp["wkv_c"], preferred_element_type=F32)    # (Ls, K+V)
    y, attn = _mha(q, kv[:, :K], kv[:, K:], src_bias[None],
                   wp["wo_c"], nh=nh, want_attn=True, recip=recip)
    x = x + y

    # --- position-wise FFN: causal conv -> ReLU -> causal conv -> ReLU ---
    # (MoEL-style common.py applies ReLU after every FFN sub-layer, incl. the last)
    xn = _layer_norm(x, wp["ln_g"][2], wp["ln_b"][2])
    h = jnp.maximum(_causal_conv(xn, wp["c1w"], wp["c1b"]), 0.0)
    h = jnp.maximum(_causal_conv(h, wp["c2w"], wp["c2b"]), 0.0)
    x = x + h
    return x, attn


# ----------------------------------------------------------------------------
# Host-side weight packing: fused QKV / KV columns, 1/sqrt(dk) folded into Q,
# bf16 for everything that feeds the MXU.
# ----------------------------------------------------------------------------
def pack_params(p, *, num_heads):
    nl, H, K = p["wq_s"].shape
    dk = K // num_heads
    scale = jnp.float32(dk ** -0.5)          # MoEL query_scale, folded into Q weights
    bf = lambda a: a.astype(BF16)
    return {
        "embw": bf(p["embw"]),
        "ln_g": p["ln_g"], "ln_b": p["ln_b"],
        "wqkv_s": bf(jnp.concatenate([p["wq_s"] * scale, p["wk_s"], p["wv_s"]], axis=-1)),
        "wo_s": bf(p["wo_s"]),
        "wq_c": bf(p["wq_c"] * scale),
        "wkv_c": bf(jnp.concatenate([p["wk_c"], p["wv_c"]], axis=-1)),
        "wo_c": bf(p["wo_c"]),
        "c1w": bf(p["c1w"]), "c1b": p["c1b"],
        "c2w": bf(p["c2w"]), "c2b": p["c2b"],
        "fln_g": p["fln_g"], "fln_b": p["fln_b"],
    }


# ----------------------------------------------------------------------------
# Pallas kernel wrapper.
# Grid = (batch [parallel], layer [arbitrary]); per-layer weights streamed by the
# layer grid id, hidden state carried across layer steps in a VMEM scratch.
# ----------------------------------------------------------------------------
def _pad_lanes(a, n):
    """Pad the last (lane) dim with zeros up to n so the output store is unmasked."""
    c = a.shape[-1]
    if c == n:
        return a
    return jnp.concatenate([a, jnp.zeros(a.shape[:-1] + (n - c,), a.dtype)], axis=-1)


def _vmem_limit_bytes():
    """Size the scoped-VMEM limit per TPU generation (v5e/v6e: 128 MiB, v7x: 64 MiB)."""
    try:
        cap = int(pltpu.get_tpu_info().vmem_capacity_bytes)
    except Exception:
        cap = 64 * 1024 * 1024
    return int(min(cap * 3 // 4, 96 * 1024 * 1024))


def decoder_forward(x, enc, mask_src, dec_mask, timing, packed, *, num_layers, num_heads):
    B, L, _E = x.shape
    Ls = enc.shape[1]
    H = packed["embw"].shape[1]
    Hp = _round_up(H, 128)
    Lsp = _round_up(Ls, 128)

    # additive mask biases precomputed outside the kernel (no in-kernel selects)
    dec_bias = jnp.where(dec_mask > 0, jnp.float32(NEG_INF), jnp.float32(0.0))   # (B, L, L)
    src_bias = jnp.where(mask_src > 0, jnp.float32(NEG_INF), jnp.float32(0.0))   # (B, 1, Ls)

    def bspec(shape):      # one example per batch-grid step; constant across layer steps
        nd = len(shape)
        return pl.BlockSpec((None,) + tuple(shape[1:]),
                            lambda b, l, _nd=nd: (b,) + (0,) * (_nd - 1))

    def cspec(shape):      # resident: same block every grid step (fetched once)
        nd = len(shape)
        return pl.BlockSpec(tuple(shape), lambda b, l, _nd=nd: (0,) * _nd)

    def lspec(shape):      # per-layer weight block: streamed / double-buffered by layer id
        nd = len(shape)
        return pl.BlockSpec((None,) + tuple(shape[1:]),
                            lambda b, l, _nd=nd: (l,) + (0,) * (_nd - 1))

    in_specs = [bspec(x.shape), bspec(enc.shape), bspec(dec_bias.shape), bspec(src_bias.shape),
                pl.BlockSpec((None, L, H), lambda b, l: (0, 0, 0)),     # timing signal
                cspec(packed["embw"].shape)]
    in_specs += [lspec(packed[k].shape) for k in PER_LAYER_KEYS]
    in_specs += [cspec(packed["fln_g"].shape), cspec(packed["fln_b"].shape)]

    args = [x, enc, dec_bias, src_bias, timing, packed["embw"]]
    args += [packed[k] for k in PER_LAYER_KEYS]
    args += [packed["fln_g"], packed["fln_b"]]

    out_shape = (jax.ShapeDtypeStruct((B, L, Hp), F32),
                 jax.ShapeDtypeStruct((B, L, Lsp), F32))
    out_specs = [bspec((B, L, Hp)), bspec((B, L, Lsp))]

    def kernel(x_ref, enc_ref, decb_ref, srcb_ref, timing_ref, embw_ref,
               ln_g_ref, ln_b_ref, wqkv_s_ref, wo_s_ref,
               wq_c_ref, wkv_c_ref, wo_c_ref,
               c1w_ref, c1b_ref, c2w_ref, c2b_ref,
               fln_g_ref, fln_b_ref,
               y_ref, attn_ref, x_carry):
        l = pl.program_id(1)

        # embedding_proj (no bias) + timing signal -- once per example (layer step 0)
        @pl.when(l == 0)
        def _():
            x0 = jnp.dot(x_ref[...].astype(BF16), embw_ref[...],
                         preferred_element_type=F32)
            x_carry[...] = x0 + timing_ref[...]

        wp = {"ln_g": ln_g_ref[...], "ln_b": ln_b_ref[...],
              "wqkv_s": wqkv_s_ref[...], "wo_s": wo_s_ref[...],
              "wq_c": wq_c_ref[...], "wkv_c": wkv_c_ref[...], "wo_c": wo_c_ref[...],
              "c1w": c1w_ref[...], "c1b": c1b_ref[...],
              "c2w": c2w_ref[...], "c2b": c2b_ref[...]}

        x_new, attn = _decoder_layer(
            x_carry[...], enc_ref[...], decb_ref[...], srcb_ref[...], wp,
            nh=num_heads, recip=lambda d: pl.reciprocal(d, approx=True))
        x_carry[...] = x_new

        # final LayerNorm + lane-dense (128-padded) output stores, last layer only
        @pl.when(l == pl.num_programs(1) - 1)
        def _():
            y = _layer_norm(x_new, fln_g_ref[...], fln_b_ref[...])
            y_ref[...] = _pad_lanes(y, Hp)
            attn_ref[...] = _pad_lanes(attn, Lsp)

    y_pad, attn_pad = pl.pallas_call(
        kernel,
        out_shape=out_shape,
        grid_spec=pltpu.PrefetchScalarGridSpec(
            num_scalar_prefetch=0,
            grid=(B, num_layers),
            in_specs=in_specs,
            out_specs=out_specs,
            scratch_shapes=[pltpu.VMEM((L, H), F32)],
        ),
        compiler_params=pltpu.CompilerParams(
            dimension_semantics=("parallel", "arbitrary"),   # batch sharded across TCs
            vmem_limit_bytes=_vmem_limit_bytes()),
    )(*args)

    return y_pad[..., :H], attn_pad[..., :Ls]


# ----------------------------------------------------------------------------
# Plain-JAX reference (same math / same packed bf16 weights, exact reciprocal).
# ----------------------------------------------------------------------------
def decoder_reference(x, enc, mask_src, dec_mask, timing, packed, *, num_layers, num_heads):
    dec_bias = jnp.where(dec_mask > 0, jnp.float32(NEG_INF), jnp.float32(0.0))
    src_bias = jnp.where(mask_src > 0, jnp.float32(NEG_INF), jnp.float32(0.0))
    B = x.shape[0]
    ys, attns = [], []
    for b in range(B):
        xb = jnp.dot(x[b].astype(BF16), packed["embw"], preferred_element_type=F32)
        xb = xb + timing[0]
        attn = None
        for l in range(num_layers):
            wp = {k: packed[k][l] for k in PER_LAYER_KEYS}
            xb, attn = _decoder_layer(xb, enc[b], dec_bias[b], src_bias[b], wp,
                                      nh=num_heads, recip=lambda d: 1.0 / d)
        ys.append(_layer_norm(xb, packed["fln_g"], packed["fln_b"]))
        attns.append(attn)
    return jnp.stack(ys, 0), jnp.stack(attns, 0)


# ----------------------------------------------------------------------------
# Deterministic parameter / signal construction.
# ----------------------------------------------------------------------------
def gen_timing_signal(length, channels, min_timescale=1.0, max_timescale=1.0e4):
    position = np.arange(length, dtype=np.float32)
    num_timescales = channels // 2
    log_inc = math.log(float(max_timescale) / float(min_timescale)) / max(num_timescales - 1, 1)
    inv_timescales = min_timescale * np.exp(np.arange(num_timescales, dtype=np.float32) * -log_inc)
    scaled_time = position[:, None] * inv_timescales[None, :]
    signal = np.concatenate([np.sin(scaled_time), np.cos(scaled_time)], axis=1)
    signal = np.pad(signal, [[0, 0], [0, channels % 2]])
    return signal.reshape(1, length, channels).astype(np.float32)


def init_params(key, *, E, H, K, V, F, num_layers):
    ks = jax.random.split(key, 16)

    def w(k, shape, fan_in):
        return (jax.random.normal(k, shape, jnp.float32) / np.sqrt(fan_in)).astype(jnp.float32)

    p = {}
    p["embw"] = w(ks[0], (E, H), E)                                  # Linear(E->H), no bias
    p["ln_g"] = jnp.ones((num_layers, 3, 1, H), jnp.float32)         # 3 LayerNorms per layer
    p["ln_b"] = jnp.zeros((num_layers, 3, 1, H), jnp.float32)
    p["wq_s"] = w(ks[1], (num_layers, H, K), H)                      # self-attn projections
    p["wk_s"] = w(ks[2], (num_layers, H, K), H)
    p["wv_s"] = w(ks[3], (num_layers, H, V), H)
    p["wo_s"] = w(ks[4], (num_layers, V, H), V)
    p["wq_c"] = w(ks[5], (num_layers, H, K), H)                      # cross-attn projections
    p["wk_c"] = w(ks[6], (num_layers, H, K), H)
    p["wv_c"] = w(ks[7], (num_layers, H, V), H)
    p["wo_c"] = w(ks[8], (num_layers, V, H), V)
    p["c1w"] = w(ks[9], (num_layers, 3, H, F), 3 * H)                # Conv1d(H->F, k=3)
    p["c1b"] = w(ks[10], (num_layers, 1, F), 3 * H)
    p["c2w"] = w(ks[11], (num_layers, 3, F, H), 3 * F)               # Conv1d(F->H, k=3)
    p["c2b"] = w(ks[12], (num_layers, 1, H), 3 * F)
    p["fln_g"] = jnp.ones((1, H), jnp.float32)                       # final LayerNorm
    p["fln_b"] = jnp.zeros((1, H), jnp.float32)
    return p


if __name__ == "__main__":
    # small config consistent with Decoder(embedding_size, hidden_size, ...)
    B, L_TRG, L_SRC = 2, 8, 10
    E, H, NUM_HEADS = 32, 32, 4
    K_DEPTH, V_DEPTH, FILTER = 32, 32, 64
    NUM_LAYERS = 2
    MAX_LEN = 64

    key = jax.random.PRNGKey(0)
    k_in, k_enc, k_par = jax.random.split(key, 3)
    inputs = jax.random.normal(k_in, (B, L_TRG, E), jnp.float32)           # [B, L, E]
    encoder_output = jax.random.normal(k_enc, (B, L_SRC, H), jnp.float32)  # [B, Ls, H]
    raw_params = init_params(k_par, E=E, H=H, K=K_DEPTH, V=V_DEPTH, F=FILTER,
                             num_layers=NUM_LAYERS)
    packed = pack_params(raw_params, num_heads=NUM_HEADS)

    # padding masks (True = padded / masked), PyTorch convention: mask = (mask_src, mask_trg)
    src_lens = np.array([10, 7])
    trg_lens = np.array([8, 6])
    mask_src = np.arange(L_SRC)[None, None, :] >= src_lens[:, None, None]   # [B,1,Ls]
    mask_trg = np.arange(L_TRG)[None, None, :] >= trg_lens[:, None, None]   # [B,1,Lt]
    subsequent = np.triu(np.ones((1, MAX_LEN, MAX_LEN), np.int32), k=1)     # _get_attn_subsequent_mask
    dec_mask = (mask_trg.astype(np.int32) + subsequent[:, :L_TRG, :L_TRG]) > 0  # torch.gt(..., 0)

    mask_src_f = jnp.asarray(mask_src, jnp.float32)    # >0 means masked
    dec_mask_f = jnp.asarray(dec_mask, jnp.float32)
    timing = jnp.asarray(gen_timing_signal(MAX_LEN, H)[:, :L_TRG, :], jnp.float32)

    y, attn = decoder_forward(inputs, encoder_output, mask_src_f, dec_mask_f, timing,
                              packed, num_layers=NUM_LAYERS, num_heads=NUM_HEADS)
    (y, attn) = jax.block_until_ready((y, attn))

    y_ref, attn_ref = decoder_reference(inputs, encoder_output, mask_src_f, dec_mask_f,
                                        timing, packed, num_layers=NUM_LAYERS,
                                        num_heads=NUM_HEADS)

    # bf16 matmuls + approx reciprocal in-kernel -> slightly looser tolerance
    np.testing.assert_allclose(np.asarray(y), np.asarray(y_ref), rtol=2e-2, atol=2e-2)

    # attn_dist is the head-mean of the *masked pre-softmax logits* (MoEL semantics):
    # compare the real (unmasked) columns tightly; masked columns should hold ~NEG_INF.
    valid = ~np.asarray(mask_src)[:, 0, :]                                   # (B, Ls)
    a_k = np.where(valid[:, None, :], np.asarray(attn), 0.0)
    a_r = np.where(valid[:, None, :], np.asarray(attn_ref), 0.0)
    np.testing.assert_allclose(a_k, a_r, rtol=2e-2, atol=2e-2)
    masked_vals = np.asarray(attn)[np.broadcast_to(~valid[:, None, :], attn.shape)]
    if masked_vals.size:
        assert np.all(masked_vals < -1e17), "masked attn columns should carry NEG_INF logits"

    print("KERNEL_OK")
</pallas_src>

<mosaic_0001>
module attributes {stable_mosaic.version = 11 : i64} {
  func.func @kernel(%arg0: i32, %arg1: i32, %arg2: memref<1x8x32xf32, #tpu.memory_space<vmem>>, %arg3: memref<1x10x32xf32, #tpu.memory_space<vmem>>, %arg4: memref<1x8x8xf32, #tpu.memory_space<vmem>>, %arg5: memref<1x1x10xf32, #tpu.memory_space<vmem>>, %arg6: memref<1x8x32xf32, #tpu.memory_space<vmem>>, %arg7: memref<32x32xbf16, #tpu.memory_space<vmem>>, %arg8: memref<1x3x1x32xf32, #tpu.memory_space<vmem>>, %arg9: memref<1x3x1x32xf32, #tpu.memory_space<vmem>>, %arg10: memref<1x32x96xbf16, #tpu.memory_space<vmem>>, %arg11: memref<1x32x32xbf16, #tpu.memory_space<vmem>>, %arg12: memref<1x32x32xbf16, #tpu.memory_space<vmem>>, %arg13: memref<1x32x64xbf16, #tpu.memory_space<vmem>>, %arg14: memref<1x32x32xbf16, #tpu.memory_space<vmem>>, %arg15: memref<1x3x32x64xbf16, #tpu.memory_space<vmem>>, %arg16: memref<1x1x64xf32, #tpu.memory_space<vmem>>, %arg17: memref<1x3x64x32xbf16, #tpu.memory_space<vmem>>, %arg18: memref<1x1x32xf32, #tpu.memory_space<vmem>>, %arg19: memref<1x32xf32, #tpu.memory_space<vmem>>, %arg20: memref<1x32xf32, #tpu.memory_space<vmem>>, %arg21: memref<1x8x128xf32, #tpu.memory_space<vmem>>, %arg22: memref<1x8x128xf32, #tpu.memory_space<vmem>>, %arg23: memref<8x32xf32, #tpu.memory_space<vmem>>) attributes {dimension_semantics = [#tpu.dimension_semantics<parallel>, #tpu.dimension_semantics<arbitrary>], iteration_bounds = array<i64: 2, 2>, scalar_prefetch = 0 : i64, scratch_operands = 1 : i64, tpu.core_type = #tpu.core_type<tc>, window_params = [{transform_indices = @transform_0, window_bounds = array<i64: 1, 8, 32>}, {transform_indices = @transform_1, window_bounds = array<i64: 1, 10, 32>}, {transform_indices = @transform_2, window_bounds = array<i64: 1, 8, 8>}, {transform_indices = @transform_3, window_bounds = array<i64: 1, 1, 10>}, {pipeline_mode = #tpu.pipeline_mode<synchronous>, transform_indices = @transform_4, window_bounds = array<i64: 1, 8, 32>}, {pipeline_mode = #tpu.pipeline_mode<synchronous>, transform_indices = @transform_5, window_bounds = array<i64: 32, 32>}, {transform_indices = @transform_6, window_bounds = array<i64: 1, 3, 1, 32>}, {transform_indices = @transform_7, window_bounds = array<i64: 1, 3, 1, 32>}, {transform_indices = @transform_8, window_bounds = array<i64: 1, 32, 96>}, {transform_indices = @transform_9, window_bounds = array<i64: 1, 32, 32>}, {transform_indices = @transform_10, window_bounds = array<i64: 1, 32, 32>}, {transform_indices = @transform_11, window_bounds = array<i64: 1, 32, 64>}, {transform_indices = @transform_12, window_bounds = array<i64: 1, 32, 32>}, {transform_indices = @transform_13, window_bounds = array<i64: 1, 3, 32, 64>}, {transform_indices = @transform_14, window_bounds = array<i64: 1, 1, 64>}, {transform_indices = @transform_15, window_bounds = array<i64: 1, 3, 64, 32>}, {transform_indices = @transform_16, window_bounds = array<i64: 1, 1, 32>}, {pipeline_mode = #tpu.pipeline_mode<synchronous>, transform_indices = @transform_17, window_bounds = array<i64: 1, 32>}, {pipeline_mode = #tpu.pipeline_mode<synchronous>, transform_indices = @transform_18, window_bounds = array<i64: 1, 32>}, {transform_indices = @transform_19, window_bounds = array<i64: 1, 8, 128>}, {transform_indices = @transform_20, window_bounds = array<i64: 1, 8, 128>}]} {
    %c0_i32 = arith.constant 0 : i32
    %0 = arith.cmpi eq, %arg1, %c0_i32 : i32
    %1 = arith.extui %0 : i1 to i32
    %c0_i32_0 = arith.constant 0 : i32
    %2 = arith.cmpi ne, %1, %c0_i32_0 : i32
    scf.if %2 {
      %c0_92 = arith.constant 0 : index
      %c0_93 = arith.constant 0 : index
      %c0_94 = arith.constant 0 : index
      %289 = vector.load %arg2[%c0_92, %c0_93, %c0_94] : memref<1x8x32xf32, #tpu.memory_space<vmem>>, vector<1x8x32xf32>
      %290 = vector.shape_cast %289 : vector<1x8x32xf32> to vector<8x32xf32>
      %291 = arith.truncf %290 : vector<8x32xf32> to vector<8x32xbf16>
      %c0_95 = arith.constant 0 : index
      %c0_96 = arith.constant 0 : index
      %292 = vector.load %arg7[%c0_95, %c0_96] : memref<32x32xbf16, #tpu.memory_space<vmem>>, vector<32x32xbf16>
      %cst_97 = arith.constant dense<0.000000e+00> : vector<8x32xf32>
      %293 = tpu.matmul %291, %292, %cst_97 {dimension_numbers = #tpu.dot_dimension_numbers<[1], [0], [0], [1], [0, 0, 1, 1], [], []>} : vector<8x32xbf16>, vector<32x32xbf16>, vector<8x32xf32> -> vector<8x32xf32>
      %c0_98 = arith.constant 0 : index
      %c0_99 = arith.constant 0 : index
      %c0_100 = arith.constant 0 : index
      %294 = vector.load %arg6[%c0_98, %c0_99, %c0_100] : memref<1x8x32xf32, #tpu.memory_space<vmem>>, vector<1x8x32xf32>
      %295 = vector.shape_cast %294 : vector<1x8x32xf32> to vector<8x32xf32>
      %296 = arith.addf %293, %295 : vector<8x32xf32>
      %c0_101 = arith.constant 0 : index
      %c0_102 = arith.constant 0 : index
      %297 = vector.load %arg23[%c0_101, %c0_102] : memref<8x32xf32, #tpu.memory_space<vmem>>, vector<8x32xf32>
      tpu.vector_store %arg23[%c0_101, %c0_102], %296 {strides = array<i32>} : memref<8x32xf32, #tpu.memory_space<vmem>>, vector<8x32xf32>,
    } else {
    }
    %c0 = arith.constant 0 : index
    %c0_1 = arith.constant 0 : index
    %c0_2 = arith.constant 0 : index
    %c0_3 = arith.constant 0 : index
    %3 = vector.load %arg8[%c0, %c0_1, %c0_2, %c0_3] : memref<1x3x1x32xf32, #tpu.memory_space<vmem>>, vector<1x3x1x32xf32>
    %4 = vector.shape_cast %3 : vector<1x3x1x32xf32> to vector<3x1x32xf32>
    %c0_4 = arith.constant 0 : index
    %c0_5 = arith.constant 0 : index
    %c0_6 = arith.constant 0 : index
    %c0_7 = arith.constant 0 : index
    %5 = vector.load %arg9[%c0_4, %c0_5, %c0_6, %c0_7] : memref<1x3x1x32xf32, #tpu.memory_space<vmem>>, vector<1x3x1x32xf32>
    %6 = vector.shape_cast %5 : vector<1x3x1x32xf32> to vector<3x1x32xf32>
    %c0_8 = arith.constant 0 : index
    %c0_9 = arith.constant 0 : index
    %c0_10 = arith.constant 0 : index
    %7 = vector.load %arg10[%c0_8, %c0_9, %c0_10] : memref<1x32x96xbf16, #tpu.memory_space<vmem>>, vector<1x32x96xbf16>
    %8 = vector.shape_cast %7 : vector<1x32x96xbf16> to vector<32x96xbf16>
    %c0_11 = arith.constant 0 : index
    %c0_12 = arith.constant 0 : index
    %c0_13 = arith.constant 0 : index
    %9 = vector.load %arg11[%c0_11, %c0_12, %c0_13] : memref<1x32x32xbf16, #tpu.memory_space<vmem>>, vector<1x32x32xbf16>
    %10 = vector.shape_cast %9 : vector<1x32x32xbf16> to vector<32x32xbf16>
    %c0_14 = arith.constant 0 : index
    %c0_15 = arith.constant 0 : index
    %c0_16 = arith.constant 0 : index
    %11 = vector.load %arg12[%c0_14, %c0_15, %c0_16] : memref<1x32x32xbf16, #tpu.memory_space<vmem>>, vector<1x32x32xbf16>
    %12 = vector.shape_cast %11 : vector<1x32x32xbf16> to vector<32x32xbf16>
    %c0_17 = arith.constant 0 : index
    %c0_18 = arith.constant 0 : index
    %c0_19 = arith.constant 0 : index
    %13 = vector.load %arg13[%c0_17, %c0_18, %c0_19] : memref<1x32x64xbf16, #tpu.memory_space<vmem>>, vector<1x32x64xbf16>
    %14 = vector.shape_cast %13 : vector<1x32x64xbf16> to vector<32x64xbf16>
    %c0_20 = arith.constant 0 : index
    %c0_21 = arith.constant 0 : index
    %c0_22 = arith.constant 0 : index
    %15 = vector.load %arg14[%c0_20, %c0_21, %c0_22] : memref<1x32x32xbf16, #tpu.memory_space<vmem>>, vector<1x32x32xbf16>
    %16 = vector.shape_cast %15 : vector<1x32x32xbf16> to vector<32x32xbf16>
    %c0_23 = arith.constant 0 : index
    %c0_24 = arith.constant 0 : index
    %c0_25 = arith.constant 0 : index
    %c0_26 = arith.constant 0 : index
    %17 = vector.load %arg15[%c0_23, %c0_24, %c0_25, %c0_26] : memref<1x3x32x64xbf16, #tpu.memory_space<vmem>>, vector<1x3x32x64xbf16>
    %18 = vector.shape_cast %17 : vector<1x3x32x64xbf16> to vector<3x32x64xbf16>
    %c0_27 = arith.constant 0 : index
    %c0_28 = arith.constant 0 : index
    %c0_29 = arith.constant 0 : index
    %19 = vector.load %arg16[%c0_27, %c0_28, %c0_29] : memref<1x1x64xf32, #tpu.memory_space<vmem>>, vector<1x1x64xf32>
    %20 = vector.shape_cast %19 : vector<1x1x64xf32> to vector<1x64xf32>
    %c0_30 = arith.constant 0 : index
    %c0_31 = arith.constant 0 : index
    %c0_32 = arith.constant 0 : index
    %c0_33 = arith.constant 0 : index
    %21 = vector.load %arg17[%c0_30, %c0_31, %c0_32, %c0_33] : memref<1x3x64x32xbf16, #tpu.memory_space<vmem>>, vector<1x3x64x32xbf16>
    %22 = vector.shape_cast %21 : vector<1x3x64x32xbf16> to vector<3x64x32xbf16>
    %c0_34 = arith.constant 0 : index
    %c0_35 = arith.constant 0 : index
    %c0_36 = arith.constant 0 : index
    %23 = vector.load %arg18[%c0_34, %c0_35, %c0_36] : memref<1x1x32xf32, #tpu.memory_space<vmem>>, vector<1x1x32xf32>
    %24 = vector.shape_cast %23 : vector<1x1x32xf32> to vector<1x32xf32>
    %c0_37 = arith.constant 0 : index
    %c0_38 = arith.constant 0 : index
    %25 = vector.load %arg23[%c0_37, %c0_38] : memref<8x32xf32, #tpu.memory_space<vmem>>, vector<8x32xf32>
    %c0_39 = arith.constant 0 : index
    %c0_40 = arith.constant 0 : index
    %c0_41 = arith.constant 0 : index
    %26 = vector.load %arg3[%c0_39, %c0_40, %c0_41] : memref<1x10x32xf32, #tpu.memory_space<vmem>>, vector<1x10x32xf32>
    %27 = vector.shape_cast %26 : vector<1x10x32xf32> to vector<10x32xf32>
    %c0_42 = arith.constant 0 : index
    %c0_43 = arith.constant 0 : index
    %c0_44 = arith.constant 0 : index
    %28 = vector.load %arg4[%c0_42, %c0_43, %c0_44] : memref<1x8x8xf32, #tpu.memory_space<vmem>>, vector<1x8x8xf32>
    %29 = vector.shape_cast %28 : vector<1x8x8xf32> to vector<8x8xf32>
    %c0_45 = arith.constant 0 : index
    %c0_46 = arith.constant 0 : index
    %c0_47 = arith.constant 0 : index
    %30 = vector.load %arg5[%c0_45, %c0_46, %c0_47] : memref<1x1x10xf32, #tpu.memory_space<vmem>>, vector<1x1x10xf32>
    %31 = vector.shape_cast %30 : vector<1x1x10xf32> to vector<1x10xf32>
    %32 = vector.extract_strided_slice %4 {offsets = [0, 0, 0], sizes = [1, 1, 32], strides = [1, 1, 1]} : vector<3x1x32xf32> to vector<1x1x32xf32>
    %33 = vector.shape_cast %32 : vector<1x1x32xf32> to vector<1x32xf32>
    %34 = vector.extract_strided_slice %6 {offsets = [0, 0, 0], sizes = [1, 1, 32], strides = [1, 1, 1]} : vector<3x1x32xf32> to vector<1x1x32xf32>
    %35 = vector.shape_cast %34 : vector<1x1x32xf32> to vector<1x32xf32>
    %cst = arith.constant dense<0.000000e+00> : vector<8xf32>
    %36 = vector.multi_reduction <add>, %25, %cst [1] : vector<8x32xf32> to vector<8xf32>
    %37 = vector.shape_cast %36 : vector<8xf32> to vector<8x1xf32>
    %cst_48 = arith.constant 3.200000e+01 : f32
    %38 = vector.broadcast %cst_48 : f32 to vector<8x1xf32>
    %39 = arith.divf %37, %38 : vector<8x1xf32>
    %40 = vector.broadcast %39 : vector<8x1xf32> to vector<8x32xf32>
    %41 = arith.subf %25, %40 : vector<8x32xf32>
    %42 = arith.mulf %41, %41 : vector<8x32xf32>
    %cst_49 = arith.constant dense<0.000000e+00> : vector<8xf32>
    %43 = vector.multi_reduction <add>, %42, %cst_49 [1] : vector<8x32xf32> to vector<8xf32>
    %44 = vector.shape_cast %43 : vector<8xf32> to vector<8x1xf32>
    %cst_50 = arith.constant 3.100000e+01 : f32
    %45 = vector.broadcast %cst_50 : f32 to vector<8x1xf32>
    %46 = arith.divf %44, %45 : vector<8x1xf32>
    %47 = vector.broadcast %39 : vector<8x1xf32> to vector<8x32xf32>
    %48 = arith.subf %25, %47 : vector<8x32xf32>
    %49 = vector.broadcast %33 : vector<1x32xf32> to vector<8x32xf32>
    %50 = arith.mulf %49, %48 : vector<8x32xf32>
    %51 = math.sqrt %46 : vector<8x1xf32>
    %cst_51 = arith.constant 9.99999997E-7 : f32
    %52 = vector.broadcast %cst_51 : f32 to vector<8x1xf32>
    %53 = arith.addf %51, %52 : vector<8x1xf32>
    %54 = vector.broadcast %53 : vector<8x1xf32> to vector<8x32xf32>
    %55 = arith.divf %50, %54 : vector<8x32xf32>
    %56 = vector.broadcast %35 : vector<1x32xf32> to vector<8x32xf32>
    %57 = arith.addf %55, %56 : vector<8x32xf32>
    %58 = arith.truncf %57 : vector<8x32xf32> to vector<8x32xbf16>
    %cst_52 = arith.constant dense<0.000000e+00> : vector<8x96xf32>
    %59 = tpu.matmul %58, %8, %cst_52 {dimension_numbers = #tpu.dot_dimension_numbers<[1], [0], [0], [1], [0, 0, 1, 1], [], []>} : vector<8x32xbf16>, vector<32x96xbf16>, vector<8x96xf32> -> vector<8x96xf32>
    %60 = vector.extract_strided_slice %59 {offsets = [0, 0], sizes = [8, 32], strides = [1, 1]} : vector<8x96xf32> to vector<8x32xf32>
    %61 = vector.extract_strided_slice %59 {offsets = [0, 32], sizes = [8, 32], strides = [1, 1]} : vector<8x96xf32> to vector<8x32xf32>
    %62 = vector.extract_strided_slice %59 {offsets = [0, 64], sizes = [8, 32], strides = [1, 1]} : vector<8x96xf32> to vector<8x32xf32>
    %63 = vector.shape_cast %29 : vector<8x8xf32> to vector<1x8x8xf32>
    %64 = arith.truncf %60 : vector<8x32xf32> to vector<8x32xbf16>
    %65 = vector.extract_strided_slice %64 {offsets = [0, 0], sizes = [8, 8], strides = [1, 1]} : vector<8x32xbf16> to vector<8x8xbf16>
    %66 = vector.shape_cast %65 : vector<8x8xbf16> to vector<1x8x8xbf16>
    %67 = vector.extract_strided_slice %64 {offsets = [0, 8], sizes = [8, 8], strides = [1, 1]} : vector<8x32xbf16> to vector<8x8xbf16>
    %68 = vector.shape_cast %67 : vector<8x8xbf16> to vector<1x8x8xbf16>
    %69 = vector.extract_strided_slice %64 {offsets = [0, 16], sizes = [8, 8], strides = [1, 1]} : vector<8x32xbf16> to vector<8x8xbf16>
    %70 = vector.shape_cast %69 : vector<8x8xbf16> to vector<1x8x8xbf16>
    %71 = vector.extract_strided_slice %64 {offsets = [0, 24], sizes = [8, 8], strides = [1, 1]} : vector<8x32xbf16> to vector<8x8xbf16>
    %72 = vector.shape_cast %71 : vector<8x8xbf16> to vector<1x8x8xbf16>
    %73 = tpu.concatenate %66, %68, %70, %72 in 0 : vector<1x8x8xbf16>, vector<1x8x8xbf16>, vector<1x8x8xbf16>, vector<1x8x8xbf16> -> vector<4x8x8xbf16>
    %74 = arith.truncf %61 : vector<8x32xf32> to vector<8x32xbf16>
    %75 = vector.extract_strided_slice %74 {offsets = [0, 0], sizes = [8, 8], strides = [1, 1]} : vector<8x32xbf16> to vector<8x8xbf16>
    %76 = vector.shape_cast %75 : vector<8x8xbf16> to vector<1x8x8xbf16>
    %77 = vector.extract_strided_slice %74 {offsets = [0, 8], sizes = [8, 8], strides = [1, 1]} : vector<8x32xbf16> to vector<8x8xbf16>
    %78 = vector.shape_cast %77 : vector<8x8xbf16> to vector<1x8x8xbf16>
    %79 = vector.extract_strided_slice %74 {offsets = [0, 16], sizes = [8, 8], strides = [1, 1]} : vector<8x32xbf16> to vector<8x8xbf16>
    %80 = vector.shape_cast %79 : vector<8x8xbf16> to vector<1x8x8xbf16>
    %81 = vector.extract_strided_slice %74 {offsets = [0, 24], sizes = [8, 8], strides = [1, 1]} : vector<8x32xbf16> to vector<8x8xbf16>
    %82 = vector.shape_cast %81 : vector<8x8xbf16> to vector<1x8x8xbf16>
    %83 = tpu.concatenate %76, %78, %80, %82 in 0 : vector<1x8x8xbf16>, vector<1x8x8xbf16>, vector<1x8x8xbf16>, vector<1x8x8xbf16> -> vector<4x8x8xbf16>
    %84 = arith.truncf %62 : vector<8x32xf32> to vector<8x32xbf16>
    %85 = vector.extract_strided_slice %84 {offsets = [0, 0], sizes = [8, 8], strides = [1, 1]} : vector<8x32xbf16> to vector<8x8xbf16>
    %86 = vector.shape_cast %85 : vector<8x8xbf16> to vector<1x8x8xbf16>
    %87 = vector.extract_strided_slice %84 {offsets = [0, 8], sizes = [8, 8], strides = [1, 1]} : vector<8x32xbf16> to vector<8x8xbf16>
    %88 = vector.shape_cast %87 : vector<8x8xbf16> to vector<1x8x8xbf16>
    %89 = vector.extract_strided_slice %84 {offsets = [0, 16], sizes = [8, 8], strides = [1, 1]} : vector<8x32xbf16> to vector<8x8xbf16>
    %90 = vector.shape_cast %89 : vector<8x8xbf16> to vector<1x8x8xbf16>
    %91 = vector.extract_strided_slice %84 {offsets = [0, 24], sizes = [8, 8], strides = [1, 1]} : vector<8x32xbf16> to vector<8x8xbf16>
    %92 = vector.shape_cast %91 : vector<8x8xbf16> to vector<1x8x8xbf16>
    %93 = tpu.concatenate %86, %88, %90, %92 in 0 : vector<1x8x8xbf16>, vector<1x8x8xbf16>, vector<1x8x8xbf16>, vector<1x8x8xbf16> -> vector<4x8x8xbf16>
    "tpu.trace_start"() <{level = 10 : i32, message = "hqd,hkd->hqk"}> : () -> ()
    %cst_53 = arith.constant dense<0.000000e+00> : vector<4x8x8xf32>
    %94 = tpu.matmul %73, %83, %cst_53 {dimension_numbers = #tpu.dot_dimension_numbers<[2], [2], [1], [1], [0, 0, 0, 1, 1, 1], [0], [0]>} : vector<4x8x8xbf16>, vector<4x8x8xbf16>, vector<4x8x8xf32> -> vector<4x8x8xf32>
    "tpu.trace_stop"() : () -> ()
    %95 = vector.broadcast %63 : vector<1x8x8xf32> to vector<4x8x8xf32>
    %96 = arith.addf %94, %95 : vector<4x8x8xf32>
    %cst_54 = arith.constant dense<0xFF800000> : vector<4x8xf32>
    %97 = vector.multi_reduction <maximumf>, %96, %cst_54 [2] : vector<4x8x8xf32> to vector<4x8xf32>
    %98 = vector.shape_cast %97 : vector<4x8xf32> to vector<4x8x1xf32>
    %99 = vector.broadcast %98 : vector<4x8x1xf32> to vector<4x8x8xf32>
    %100 = arith.subf %96, %99 : vector<4x8x8xf32>
    %101 = math.exp %100 : vector<4x8x8xf32>
    %cst_55 = arith.constant dense<0.000000e+00> : vector<4x8xf32>
    %102 = vector.multi_reduction <add>, %101, %cst_55 [2] : vector<4x8x8xf32> to vector<4x8xf32>
    %103 = vector.shape_cast %102 : vector<4x8xf32> to vector<4x8x1xf32>
    %104 = tpu.reciprocal %103 {approx = true} : vector<4x8x1xf32> -> vector<4x8x1xf32>
    %105 = vector.broadcast %104 : vector<4x8x1xf32> to vector<4x8x8xf32>
    %106 = arith.mulf %101, %105 : vector<4x8x8xf32>
    %107 = arith.truncf %106 : vector<4x8x8xf32> to vector<4x8x8xbf16>
    "tpu.trace_start"() <{level = 10 : i32, message = "hqk,hkd->hqd"}> : () -> ()
    %cst_56 = arith.constant dense<0.000000e+00> : vector<4x8x8xf32>
    %108 = tpu.matmul %107, %93, %cst_56 {dimension_numbers = #tpu.dot_dimension_numbers<[2], [1], [1], [2], [0, 0, 0, 1, 1, 2], [0], [0]>} : vector<4x8x8xbf16>, vector<4x8x8xbf16>, vector<4x8x8xf32> -> vector<4x8x8xf32>
    "tpu.trace_stop"() : () -> ()
    %109 = vector.extract_strided_slice %108 {offsets = [0, 0, 0], sizes = [1, 8, 8], strides = [1, 1, 1]} : vector<4x8x8xf32> to vector<1x8x8xf32>
    %110 = vector.shape_cast %109 : vector<1x8x8xf32> to vector<8x8xf32>
    %111 = vector.extract_strided_slice %108 {offsets = [1, 0, 0], sizes = [1, 8, 8], strides = [1, 1, 1]} : vector<4x8x8xf32> to vector<1x8x8xf32>
    %112 = vector.shape_cast %111 : vector<1x8x8xf32> to vector<8x8xf32>
    %113 = vector.extract_strided_slice %108 {offsets = [2, 0, 0], sizes = [1, 8, 8], strides = [1, 1, 1]} : vector<4x8x8xf32> to vector<1x8x8xf32>
    %114 = vector.shape_cast %113 : vector<1x8x8xf32> to vector<8x8xf32>
    %115 = vector.extract_strided_slice %108 {offsets = [3, 0, 0], sizes = [1, 8, 8], strides = [1, 1, 1]} : vector<4x8x8xf32> to vector<1x8x8xf32>
    %116 = vector.shape_cast %115 : vector<1x8x8xf32> to vector<8x8xf32>
    %117 = tpu.concatenate %110, %112, %114, %116 in 1 : vector<8x8xf32>, vector<8x8xf32>, vector<8x8xf32>, vector<8x8xf32> -> vector<8x32xf32>
    %118 = arith.truncf %117 : vector<8x32xf32> to vector<8x32xbf16>
    %cst_57 = arith.constant dense<0.000000e+00> : vector<8x32xf32>
    %119 = tpu.matmul %118, %10, %cst_57 {dimension_numbers = #tpu.dot_dimension_numbers<[1], [0], [0], [1], [0, 0, 1, 1], [], []>} : vector<8x32xbf16>, vector<32x32xbf16>, vector<8x32xf32> -> vector<8x32xf32>
    %120 = arith.addf %25, %119 : vector<8x32xf32>
    %121 = vector.extract_strided_slice %4 {offsets = [1, 0, 0], sizes = [1, 1, 32], strides = [1, 1, 1]} : vector<3x1x32xf32> to vector<1x1x32xf32>
    %122 = vector.shape_cast %121 : vector<1x1x32xf32> to vector<1x32xf32>
    %123 = vector.extract_strided_slice %6 {offsets = [1, 0, 0], sizes = [1, 1, 32], strides = [1, 1, 1]} : vector<3x1x32xf32> to vector<1x1x32xf32>
    %124 = vector.shape_cast %123 : vector<1x1x32xf32> to vector<1x32xf32>
    %cst_58 = arith.constant dense<0.000000e+00> : vector<8xf32>
    %125 = vector.multi_reduction <add>, %120, %cst_58 [1] : vector<8x32xf32> to vector<8xf32>
    %126 = vector.shape_cast %125 : vector<8xf32> to vector<8x1xf32>
    %cst_59 = arith.constant 3.200000e+01 : f32
    %127 = vector.broadcast %cst_59 : f32 to vector<8x1xf32>
    %128 = arith.divf %126, %127 : vector<8x1xf32>
    %129 = vector.broadcast %128 : vector<8x1xf32> to vector<8x32xf32>
    %130 = arith.subf %120, %129 : vector<8x32xf32>
    %131 = arith.mulf %130, %130 : vector<8x32xf32>
    %cst_60 = arith.constant dense<0.000000e+00> : vector<8xf32>
    %132 = vector.multi_reduction <add>, %131, %cst_60 [1] : vector<8x32xf32> to vector<8xf32>
    %133 = vector.shape_cast %132 : vector<8xf32> to vector<8x1xf32>
    %cst_61 = arith.constant 3.100000e+01 : f32
    %134 = vector.broadcast %cst_61 : f32 to vector<8x1xf32>
    %135 = arith.divf %133, %134 : vector<8x1xf32>
    %136 = vector.broadcast %128 : vector<8x1xf32> to vector<8x32xf32>
    %137 = arith.subf %120, %136 : vector<8x32xf32>
    %138 = vector.broadcast %122 : vector<1x32xf32> to vector<8x32xf32>
    %139 = arith.mulf %138, %137 : vector<8x32xf32>
    %140 = math.sqrt %135 : vector<8x1xf32>
    %cst_62 = arith.constant 9.99999997E-7 : f32
    %141 = vector.broadcast %cst_62 : f32 to vector<8x1xf32>
    %142 = arith.addf %140, %141 : vector<8x1xf32>
    %143 = vector.broadcast %142 : vector<8x1xf32> to vector<8x32xf32>
    %144 = arith.divf %139, %143 : vector<8x32xf32>
    %145 = vector.broadcast %124 : vector<1x32xf32> to vector<8x32xf32>
    %146 = arith.addf %144, %145 : vector<8x32xf32>
    %147 = arith.truncf %146 : vector<8x32xf32> to vector<8x32xbf16>
    %cst_63 = arith.constant dense<0.000000e+00> : vector<8x32xf32>
    %148 = tpu.matmul %147, %12, %cst_63 {dimension_numbers = #tpu.dot_dimension_numbers<[1], [0], [0], [1], [0, 0, 1, 1], [], []>} : vector<8x32xbf16>, vector<32x32xbf16>, vector<8x32xf32> -> vector<8x32xf32>
    %149 = arith.truncf %27 : vector<10x32xf32> to vector<10x32xbf16>
    %cst_64 = arith.constant dense<0.000000e+00> : vector<10x64xf32>
    %150 = tpu.matmul %149, %14, %cst_64 {dimension_numbers = #tpu.dot_dimension_numbers<[1], [0], [0], [1], [0, 0, 1, 1], [], []>} : vector<10x32xbf16>, vector<32x64xbf16>, vector<10x64xf32> -> vector<10x64xf32>
    %151 = vector.extract_strided_slice %150 {offsets = [0, 0], sizes = [10, 32], strides = [1, 1]} : vector<10x64xf32> to vector<10x32xf32>
    %152 = vector.extract_strided_slice %150 {offsets = [0, 32], sizes = [10, 32], strides = [1, 1]} : vector<10x64xf32> to vector<10x32xf32>
    %153 = vector.shape_cast %31 : vector<1x10xf32> to vector<1x1x10xf32>
    %154 = arith.truncf %148 : vector<8x32xf32> to vector<8x32xbf16>
    %155 = vector.extract_strided_slice %154 {offsets = [0, 0], sizes = [8, 8], strides = [1, 1]} : vector<8x32xbf16> to vector<8x8xbf16>
    %156 = vector.shape_cast %155 : vector<8x8xbf16> to vector<1x8x8xbf16>
    %157 = vector.extract_strided_slice %154 {offsets = [0, 8], sizes = [8, 8], strides = [1, 1]} : vector<8x32xbf16> to vector<8x8xbf16>
    %158 = vector.shape_cast %157 : vector<8x8xbf16> to vector<1x8x8xbf16>
    %159 = vector.extract_strided_slice %154 {offsets = [0, 16], sizes = [8, 8], strides = [1, 1]} : vector<8x32xbf16> to vector<8x8xbf16>
    %160 = vector.shape_cast %159 : vector<8x8xbf16> to vector<1x8x8xbf16>
    %161 = vector.extract_strided_slice %154 {offsets = [0, 24], sizes = [8, 8], strides = [1, 1]} : vector<8x32xbf16> to vector<8x8xbf16>
    %162 = vector.shape_cast %161 : vector<8x8xbf16> to vector<1x8x8xbf16>
    %163 = tpu.concatenate %156, %158, %160, %162 in 0 : vector<1x8x8xbf16>, vector<1x8x8xbf16>, vector<1x8x8xbf16>, vector<1x8x8xbf16> -> vector<4x8x8xbf16>
    %164 = arith.truncf %151 : vector<10x32xf32> to vector<10x32xbf16>
    %165 = vector.extract_strided_slice %164 {offsets = [0, 0], sizes = [10, 8], strides = [1, 1]} : vector<10x32xbf16> to vector<10x8xbf16>
    %166 = vector.shape_cast %165 : vector<10x8xbf16> to vector<1x10x8xbf16>
    %167 = vector.extract_strided_slice %164 {offsets = [0, 8], sizes = [10, 8], strides = [1, 1]} : vector<10x32xbf16> to vector<10x8xbf16>
    %168 = vector.shape_cast %167 : vector<10x8xbf16> to vector<1x10x8xbf16>
    %169 = vector.extract_strided_slice %164 {offsets = [0, 16], sizes = [10, 8], strides = [1, 1]} : vector<10x32xbf16> to vector<10x8xbf16>
    %170 = vector.shape_cast %169 : vector<10x8xbf16> to vector<1x10x8xbf16>
    %171 = vector.extract_strided_slice %164 {offsets = [0, 24], sizes = [10, 8], strides = [1, 1]} : vector<10x32xbf16> to vector<10x8xbf16>
    %172 = vector.shape_cast %171 : vector<10x8xbf16> to vector<1x10x8xbf16>
    %173 = tpu.concatenate %166, %168, %170, %172 in 0 : vector<1x10x8xbf16>, vector<1x10x8xbf16>, vector<1x10x8xbf16>, vector<1x10x8xbf16> -> vector<4x10x8xbf16>
    %174 = arith.truncf %152 : vector<10x32xf32> to vector<10x32xbf16>
    %175 = vector.extract_strided_slice %174 {offsets = [0, 0], sizes = [10, 8], strides = [1, 1]} : vector<10x32xbf16> to vector<10x8xbf16>
    %176 = vector.shape_cast %175 : vector<10x8xbf16> to vector<1x10x8xbf16>
    %177 = vector.extract_strided_slice %174 {offsets = [0, 8], sizes = [10, 8], strides = [1, 1]} : vector<10x32xbf16> to vector<10x8xbf16>
    %178 = vector.shape_cast %177 : vector<10x8xbf16> to vector<1x10x8xbf16>
    %179 = vector.extract_strided_slice %174 {offsets = [0, 16], sizes = [10, 8], strides = [1, 1]} : vector<10x32xbf16> to vector<10x8xbf16>
    %180 = vector.shape_cast %179 : vector<10x8xbf16> to vector<1x10x8xbf16>
    %181 = vector.extract_strided_slice %174 {offsets = [0, 24], sizes = [10, 8], strides = [1, 1]} : vector<10x32xbf16> to vector<10x8xbf16>
    %182 = vector.shape_cast %181 : vector<10x8xbf16> to vector<1x10x8xbf16>
    %183 = tpu.concatenate %176, %178, %180, %182 in 0 : vector<1x10x8xbf16>, vector<1x10x8xbf16>, vector<1x10x8xbf16>, vector<1x10x8xbf16> -> vector<4x10x8xbf16>
    "tpu.trace_start"() <{level = 10 : i32, message = "hqd,hkd->hqk"}> : () -> ()
    %cst_65 = arith.constant dense<0.000000e+00> : vector<4x8x10xf32>
    %184 = tpu.matmul %163, %173, %cst_65 {dimension_numbers = #tpu.dot_dimension_numbers<[2], [2], [1], [1], [0, 0, 0, 1, 1, 1], [0], [0]>} : vector<4x8x8xbf16>, vector<4x10x8xbf16>, vector<4x8x10xf32> -> vector<4x8x10xf32>
    "tpu.trace_stop"() : () -> ()
    %185 = vector.broadcast %153 : vector<1x1x10xf32> to vector<4x8x10xf32>
    %186 = arith.addf %184, %185 : vector<4x8x10xf32>
    %cst_66 = arith.constant dense<0xFF800000> : vector<4x8xf32>
    %187 = vector.multi_reduction <maximumf>, %186, %cst_66 [2] : vector<4x8x10xf32> to vector<4x8xf32>
    %188 = vector.shape_cast %187 : vector<4x8xf32> to vector<4x8x1xf32>
    %189 = vector.broadcast %188 : vector<4x8x1xf32> to vector<4x8x10xf32>
    %190 = arith.subf %186, %189 : vector<4x8x10xf32>
    %191 = math.exp %190 : vector<4x8x10xf32>
    %cst_67 = arith.constant dense<0.000000e+00> : vector<4x8xf32>
    %192 = vector.multi_reduction <add>, %191, %cst_67 [2] : vector<4x8x10xf32> to vector<4x8xf32>
    %193 = vector.shape_cast %192 : vector<4x8xf32> to vector<4x8x1xf32>
    %194 = tpu.reciprocal %193 {approx = true} : vector<4x8x1xf32> -> vector<4x8x1xf32>
    %195 = vector.broadcast %194 : vector<4x8x1xf32> to vector<4x8x10xf32>
    %196 = arith.mulf %191, %195 : vector<4x8x10xf32>
    %197 = arith.truncf %196 : vector<4x8x10xf32> to vector<4x8x10xbf16>
    "tpu.trace_start"() <{level = 10 : i32, message = "hqk,hkd->hqd"}> : () -> ()
    %cst_68 = arith.constant dense<0.000000e+00> : vector<4x8x8xf32>
    %198 = tpu.matmul %197, %183, %cst_68 {dimension_numbers = #tpu.dot_dimension_numbers<[2], [1], [1], [2], [0, 0, 0, 1, 1, 2], [0], [0]>} : vector<4x8x10xbf16>, vector<4x10x8xbf16>, vector<4x8x8xf32> -> vector<4x8x8xf32>
    "tpu.trace_stop"() : () -> ()
    %199 = vector.extract_strided_slice %198 {offsets = [0, 0, 0], sizes = [1, 8, 8], strides = [1, 1, 1]} : vector<4x8x8xf32> to vector<1x8x8xf32>
    %200 = vector.shape_cast %199 : vector<1x8x8xf32> to vector<8x8xf32>
    %201 = vector.extract_strided_slice %198 {offsets = [1, 0, 0], sizes = [1, 8, 8], strides = [1, 1, 1]} : vector<4x8x8xf32> to vector<1x8x8xf32>
    %202 = vector.shape_cast %201 : vector<1x8x8xf32> to vector<8x8xf32>
    %203 = vector.extract_strided_slice %198 {offsets = [2, 0, 0], sizes = [1, 8, 8], strides = [1, 1, 1]} : vector<4x8x8xf32> to vector<1x8x8xf32>
    %204 = vector.shape_cast %203 : vector<1x8x8xf32> to vector<8x8xf32>
    %205 = vector.extract_strided_slice %198 {offsets = [3, 0, 0], sizes = [1, 8, 8], strides = [1, 1, 1]} : vector<4x8x8xf32> to vector<1x8x8xf32>
    %206 = vector.shape_cast %205 : vector<1x8x8xf32> to vector<8x8xf32>
    %207 = tpu.concatenate %200, %202, %204, %206 in 1 : vector<8x8xf32>, vector<8x8xf32>, vector<8x8xf32>, vector<8x8xf32> -> vector<8x32xf32>
    %208 = arith.truncf %207 : vector<8x32xf32> to vector<8x32xbf16>
    %cst_69 = arith.constant dense<0.000000e+00> : vector<8x32xf32>
    %209 = tpu.matmul %208, %16, %cst_69 {dimension_numbers = #tpu.dot_dimension_numbers<[1], [0], [0], [1], [0, 0, 1, 1], [], []>} : vector<8x32xbf16>, vector<32x32xbf16>, vector<8x32xf32> -> vector<8x32xf32>
    %cst_70 = arith.constant dense<0.000000e+00> : vector<8x10xf32>
    %210 = vector.multi_reduction <add>, %186, %cst_70 [0] : vector<4x8x10xf32> to vector<8x10xf32>
    %cst_71 = arith.constant 2.500000e-01 : f32
    %211 = vector.broadcast %cst_71 : f32 to vector<8x10xf32>
    %212 = arith.mulf %210, %211 : vector<8x10xf32>
    %213 = arith.addf %120, %209 : vector<8x32xf32>
    %214 = vector.extract_strided_slice %4 {offsets = [2, 0, 0], sizes = [1, 1, 32], strides = [1, 1, 1]} : vector<3x1x32xf32> to vector<1x1x32xf32>
    %215 = vector.shape_cast %214 : vector<1x1x32xf32> to vector<1x32xf32>
    %216 = vector.extract_strided_slice %6 {offsets = [2, 0, 0], sizes = [1, 1, 32], strides = [1, 1, 1]} : vector<3x1x32xf32> to vector<1x1x32xf32>
    %217 = vector.shape_cast %216 : vector<1x1x32xf32> to vector<1x32xf32>
    %cst_72 = arith.constant dense<0.000000e+00> : vector<8xf32>
    %218 = vector.multi_reduction <add>, %213, %cst_72 [1] : vector<8x32xf32> to vector<8xf32>
    %219 = vector.shape_cast %218 : vector<8xf32> to vector<8x1xf32>
    %cst_73 = arith.constant 3.200000e+01 : f32
    %220 = vector.broadcast %cst_73 : f32 to vector<8x1xf32>
    %221 = arith.divf %219, %220 : vector<8x1xf32>
    %222 = vector.broadcast %221 : vector<8x1xf32> to vector<8x32xf32>
    %223 = arith.subf %213, %222 : vector<8x32xf32>
    %224 = arith.mulf %223, %223 : vector<8x32xf32>
    %cst_74 = arith.constant dense<0.000000e+00> : vector<8xf32>
    %225 = vector.multi_reduction <add>, %224, %cst_74 [1] : vector<8x32xf32> to vector<8xf32>
    %226 = vector.shape_cast %225 : vector<8xf32> to vector<8x1xf32>
    %cst_75 = arith.constant 3.100000e+01 : f32
    %227 = vector.broadcast %cst_75 : f32 to vector<8x1xf32>
    %228 = arith.divf %226, %227 : vector<8x1xf32>
    %229 = vector.broadcast %221 : vector<8x1xf32> to vector<8x32xf32>
    %230 = arith.subf %213, %229 : vector<8x32xf32>
    %231 = vector.broadcast %215 : vector<1x32xf32> to vector<8x32xf32>
    %232 = arith.mulf %231, %230 : vector<8x32xf32>
    %233 = math.sqrt %228 : vector<8x1xf32>
    %cst_76 = arith.constant 9.99999997E-7 : f32
    %234 = vector.broadcast %cst_76 : f32 to vector<8x1xf32>
    %235 = arith.addf %233, %234 : vector<8x1xf32>
    %236 = vector.broadcast %235 : vector<8x1xf32> to vector<8x32xf32>
    %237 = arith.divf %232, %236 : vector<8x32xf32>
    %238 = vector.broadcast %217 : vector<1x32xf32> to vector<8x32xf32>
    %239 = arith.addf %237, %238 : vector<8x32xf32>
    %240 = arith.truncf %239 : vector<8x32xf32> to vector<8x32xbf16>
    %241 = vector.extract_strided_slice %18 {offsets = [2, 0, 0], sizes = [1, 32, 64], strides = [1, 1, 1]} : vector<3x32x64xbf16> to vector<1x32x64xbf16>
    %242 = vector.shape_cast %241 : vector<1x32x64xbf16> to vector<32x64xbf16>
    %cst_77 = arith.constant dense<0.000000e+00> : vector<8x64xf32>
    %243 = tpu.matmul %240, %242, %cst_77 {dimension_numbers = #tpu.dot_dimension_numbers<[1], [0], [0], [1], [0, 0, 1, 1], [], []>} : vector<8x32xbf16>, vector<32x64xbf16>, vector<8x64xf32> -> vector<8x64xf32>
    %cst_78 = arith.constant 0.000000e+00 : bf16
    %244 = vector.broadcast %cst_78 : bf16 to vector<1x32xbf16>
    %245 = vector.extract_strided_slice %240 {offsets = [0, 0], sizes = [7, 32], strides = [1, 1]} : vector<8x32xbf16> to vector<7x32xbf16>
    %246 = tpu.concatenate %244, %245 in 0 : vector<1x32xbf16>, vector<7x32xbf16> -> vector<8x32xbf16>
    %247 = vector.extract_strided_slice %18 {offsets = [1, 0, 0], sizes = [1, 32, 64], strides = [1, 1, 1]} : vector<3x32x64xbf16> to vector<1x32x64xbf16>
    %248 = vector.shape_cast %247 : vector<1x32x64xbf16> to vector<32x64xbf16>
    %cst_79 = arith.constant dense<0.000000e+00> : vector<8x64xf32>
    %249 = tpu.matmul %246, %248, %cst_79 {dimension_numbers = #tpu.dot_dimension_numbers<[1], [0], [0], [1], [0, 0, 1, 1], [], []>} : vector<8x32xbf16>, vector<32x64xbf16>, vector<8x64xf32> -> vector<8x64xf32>
    %250 = arith.addf %243, %249 : vector<8x64xf32>
    %cst_80 = arith.constant 0.000000e+00 : bf16
    %251 = vector.broadcast %cst_80 : bf16 to vector<2x32xbf16>
    %252 = vector.extract_strided_slice %240 {offsets = [0, 0], sizes = [6, 32], strides = [1, 1]} : vector<8x32xbf16> to vector<6x32xbf16>
    %253 = tpu.concatenate %251, %252 in 0 : vector<2x32xbf16>, vector<6x32xbf16> -> vector<8x32xbf16>
    %254 = vector.extract_strided_slice %18 {offsets = [0, 0, 0], sizes = [1, 32, 64], strides = [1, 1, 1]} : vector<3x32x64xbf16> to vector<1x32x64xbf16>
    %255 = vector.shape_cast %254 : vector<1x32x64xbf16> to vector<32x64xbf16>
    %cst_81 = arith.constant dense<0.000000e+00> : vector<8x64xf32>
    %256 = tpu.matmul %253, %255, %cst_81 {dimension_numbers = #tpu.dot_dimension_numbers<[1], [0], [0], [1], [0, 0, 1, 1], [], []>} : vector<8x32xbf16>, vector<32x64xbf16>, vector<8x64xf32> -> vector<8x64xf32>
    %257 = arith.addf %250, %256 : vector<8x64xf32>
    %258 = vector.broadcast %20 : vector<1x64xf32> to vector<8x64xf32>
    %259 = arith.addf %257, %258 : vector<8x64xf32>
    %cst_82 = arith.constant 0.000000e+00 : f32
    %260 = vector.broadcast %cst_82 : f32 to vector<8x64xf32>
    %261 = arith.maximumf %259, %260 : vector<8x64xf32>
    %262 = arith.truncf %261 : vector<8x64xf32> to vector<8x64xbf16>
    %263 = vector.extract_strided_slice %22 {offsets = [2, 0, 0], sizes = [1, 64, 32], strides = [1, 1, 1]} : vector<3x64x32xbf16> to vector<1x64x32xbf16>
    %264 = vector.shape_cast %263 : vector<1x64x32xbf16> to vector<64x32xbf16>
    %cst_83 = arith.constant dense<0.000000e+00> : vector<8x32xf32>
    %265 = tpu.matmul %262, %264, %cst_83 {dimension_numbers = #tpu.dot_dimension_numbers<[1], [0], [0], [1], [0, 0, 1, 1], [], []>} : vector<8x64xbf16>, vector<64x32xbf16>, vector<8x32xf32> -> vector<8x32xf32>
    %cst_84 = arith.constant 0.000000e+00 : bf16
    %266 = vector.broadcast %cst_84 : bf16 to vector<1x64xbf16>
    %267 = vector.extract_strided_slice %262 {offsets = [0, 0], sizes = [7, 64], strides = [1, 1]} : vector<8x64xbf16> to vector<7x64xbf16>
    %268 = tpu.concatenate %266, %267 in 0 : vector<1x64xbf16>, vector<7x64xbf16> -> vector<8x64xbf16>
    %269 = vector.extract_strided_slice %22 {offsets = [1, 0, 0], sizes = [1, 64, 32], strides = [1, 1, 1]} : vector<3x64x32xbf16> to vector<1x64x32xbf16>
    %270 = vector.shape_cast %269 : vector<1x64x32xbf16> to vector<64x32xbf16>
    %cst_85 = arith.constant dense<0.000000e+00> : vector<8x32xf32>
    %271 = tpu.matmul %268, %270, %cst_85 {dimension_numbers = #tpu.dot_dimension_numbers<[1], [0], [0], [1], [0, 0, 1, 1], [], []>} : vector<8x64xbf16>, vector<64x32xbf16>, vector<8x32xf32> -> vector<8x32xf32>
    %272 = arith.addf %265, %271 : vector<8x32xf32>
    %cst_86 = arith.constant 0.000000e+00 : bf16
    %273 = vector.broadcast %cst_86 : bf16 to vector<2x64xbf16>
    %274 = vector.extract_strided_slice %262 {offsets = [0, 0], sizes = [6, 64], strides = [1, 1]} : vector<8x64xbf16> to vector<6x64xbf16>
    %275 = tpu.concatenate %273, %274 in 0 : vector<2x64xbf16>, vector<6x64xbf16> -> vector<8x64xbf16>
    %276 = vector.extract_strided_slice %22 {offsets = [0, 0, 0], sizes = [1, 64, 32], strides = [1, 1, 1]} : vector<3x64x32xbf16> to vector<1x64x32xbf16>
    %277 = vector.shape_cast %276 : vector<1x64x32xbf16> to vector<64x32xbf16>
    %cst_87 = arith.constant dense<0.000000e+00> : vector<8x32xf32>
    %278 = tpu.matmul %275, %277, %cst_87 {dimension_numbers = #tpu.dot_dimension_numbers<[1], [0], [0], [1], [0, 0, 1, 1], [], []>} : vector<8x64xbf16>, vector<64x32xbf16>, vector<8x32xf32> -> vector<8x32xf32>
    %279 = arith.addf %272, %278 : vector<8x32xf32>
    %280 = vector.broadcast %24 : vector<1x32xf32> to vector<8x32xf32>
    %281 = arith.addf %279, %280 : vector<8x32xf32>
    %cst_88 = arith.constant 0.000000e+00 : f32
    %282 = vector.broadcast %cst_88 : f32 to vector<8x32xf32>
    %283 = arith.maximumf %281, %282 : vector<8x32xf32>
    %284 = arith.addf %213, %283 : vector<8x32xf32>
    %c0_89 = arith.constant 0 : index
    %c0_90 = arith.constant 0 : index
    %285 = vector.load %arg23[%c0_89, %c0_90] : memref<8x32xf32, #tpu.memory_space<vmem>>, vector<8x32xf32>
    tpu.vector_store %arg23[%c0_89, %c0_90], %284 {strides = array<i32>} : memref<8x32xf32, #tpu.memory_space<vmem>>, vector<8x32xf32>,
    %c1_i32 = arith.constant 1 : i32
    %286 = arith.cmpi eq, %arg1, %c1_i32 : i32
    %287 = arith.extui %286 : i1 to i32
    %c0_i32_91 = arith.constant 0 : i32
    %288 = arith.cmpi ne, %287, %c0_i32_91 : i32
    scf.if %288 {
      %c0_92 = arith.constant 0 : index
      %c0_93 = arith.constant 0 : index
      %289 = vector.load %arg19[%c0_92, %c0_93] : memref<1x32xf32, #tpu.memory_space<vmem>>, vector<1x32xf32>
      %c0_94 = arith.constant 0 : index
      %c0_95 = arith.constant 0 : index
      %290 = vector.load %arg20[%c0_94, %c0_95] : memref<1x32xf32, #tpu.memory_space<vmem>>, vector<1x32xf32>
      %cst_96 = arith.constant dense<0.000000e+00> : vector<8xf32>
      %291 = vector.multi_reduction <add>, %284, %cst_96 [1] : vector<8x32xf32> to vector<8xf32>
      %292 = vector.shape_cast %291 : vector<8xf32> to vector<8x1xf32>
      %cst_97 = arith.constant 3.200000e+01 : f32
      %293 = vector.broadcast %cst_97 : f32 to vector<8x1xf32>
      %294 = arith.divf %292, %293 : vector<8x1xf32>
      %295 = vector.broadcast %294 : vector<8x1xf32> to vector<8x32xf32>
      %296 = arith.subf %284, %295 : vector<8x32xf32>
      %297 = arith.mulf %296, %296 : vector<8x32xf32>
      %cst_98 = arith.constant dense<0.000000e+00> : vector<8xf32>
      %298 = vector.multi_reduction <add>, %297, %cst_98 [1] : vector<8x32xf32> to vector<8xf32>
      %299 = vector.shape_cast %298 : vector<8xf32> to vector<8x1xf32>
      %cst_99 = arith.constant 3.100000e+01 : f32
      %300 = vector.broadcast %cst_99 : f32 to vector<8x1xf32>
      %301 = arith.divf %299, %300 : vector<8x1xf32>
      %302 = vector.broadcast %294 : vector<8x1xf32> to vector<8x32xf32>
      %303 = arith.subf %284, %302 : vector<8x32xf32>
      %304 = vector.broadcast %289 : vector<1x32xf32> to vector<8x32xf32>
      %305 = arith.mulf %304, %303 : vector<8x32xf32>
      %306 = math.sqrt %301 : vector<8x1xf32>
      %cst_100 = arith.constant 9.99999997E-7 : f32
      %307 = vector.broadcast %cst_100 : f32 to vector<8x1xf32>
      %308 = arith.addf %306, %307 : vector<8x1xf32>
      %309 = vector.broadcast %308 : vector<8x1xf32> to vector<8x32xf32>
      %310 = arith.divf %305, %309 : vector<8x32xf32>
      %311 = vector.broadcast %290 : vector<1x32xf32> to vector<8x32xf32>
      %312 = arith.addf %310, %311 : vector<8x32xf32>
      %cst_101 = arith.constant 0.000000e+00 : f32
      %313 = vector.broadcast %cst_101 : f32 to vector<8x96xf32>
      %314 = tpu.concatenate %312, %313 in 1 : vector<8x32xf32>, vector<8x96xf32> -> vector<8x128xf32>
      %c0_102 = arith.constant 0 : index
      %c0_103 = arith.constant 0 : index
      %c0_104 = arith.constant 0 : index
      %315 = vector.load %arg21[%c0_102, %c0_103, %c0_104] : memref<1x8x128xf32, #tpu.memory_space<vmem>>, vector<1x8x128xf32>
      %316 = vector.shape_cast %315 : vector<1x8x128xf32> to vector<8x128xf32>
      %317 = vector.shape_cast %314 : vector<8x128xf32> to vector<1x8x128xf32>
      tpu.vector_store %arg21[%c0_102, %c0_103, %c0_104], %317 {strides = array<i32>} : memref<1x8x128xf32, #tpu.memory_space<vmem>>, vector<1x8x128xf32>,
      %cst_105 = arith.constant 0.000000e+00 : f32
      %318 = vector.broadcast %cst_105 : f32 to vector<8x118xf32>
      %319 = tpu.concatenate %212, %318 in 1 : vector<8x10xf32>, vector<8x118xf32> -> vector<8x128xf32>
      %c0_106 = arith.constant 0 : index
      %c0_107 = arith.constant 0 : index
      %c0_108 = arith.constant 0 : index
      %320 = vector.load %arg22[%c0_106, %c0_107, %c0_108] : memref<1x8x128xf32, #tpu.memory_space<vmem>>, vector<1x8x128xf32>
      %321 = vector.shape_cast %320 : vector<1x8x128xf32> to vector<8x128xf32>
      %322 = vector.shape_cast %319 : vector<8x128xf32> to vector<1x8x128xf32>
      tpu.vector_store %arg22[%c0_106, %c0_107, %c0_108], %322 {strides = array<i32>} : memref<1x8x128xf32, #tpu.memory_space<vmem>>, vector<1x8x128xf32>,
    } else {
    }
    return
  }
  func.func @transform_0(%arg0: i32, %arg1: i32) -> (i32, i32, i32) {
    %c0_i32 = arith.constant 0 : i32
    %c0_i32_0 = arith.constant 0 : i32
    %c0_i32_1 = arith.constant 0 : i32
    return %arg0, %c0_i32, %c0_i32_0 : i32, i32, i32
  }
  func.func @transform_1(%arg0: i32, %arg1: i32) -> (i32, i32, i32) {
    %c0_i32 = arith.constant 0 : i32
    %c0_i32_0 = arith.constant 0 : i32
    %c0_i32_1 = arith.constant 0 : i32
    return %arg0, %c0_i32, %c0_i32_0 : i32, i32, i32
  }
  func.func @transform_2(%arg0: i32, %arg1: i32) -> (i32, i32, i32) {
    %c0_i32 = arith.constant 0 : i32
    %c0_i32_0 = arith.constant 0 : i32
    %c0_i32_1 = arith.constant 0 : i32
    return %arg0, %c0_i32, %c0_i32_0 : i32, i32, i32
  }
  func.func @transform_3(%arg0: i32, %arg1: i32) -> (i32, i32, i32) {
    %c0_i32 = arith.constant 0 : i32
    %c0_i32_0 = arith.constant 0 : i32
    %c0_i32_1 = arith.constant 0 : i32
    return %arg0, %c0_i32, %c0_i32_0 : i32, i32, i32
  }
  func.func @transform_4(%arg0: i32, %arg1: i32) -> (i32, i32, i32) {
    %c0_i32 = arith.constant 0 : i32
    %c0_i32_0 = arith.constant 0 : i32
    %c0_i32_1 = arith.constant 0 : i32
    %c0_i32_2 = arith.constant 0 : i32
    return %c0_i32, %c0_i32_0, %c0_i32_1 : i32, i32, i32
  }
  func.func @transform_5(%arg0: i32, %arg1: i32) -> (i32, i32) {
    %c0_i32 = arith.constant 0 : i32
    %c0_i32_0 = arith.constant 0 : i32
    %c0_i32_1 = arith.constant 0 : i32
    return %c0_i32, %c0_i32_0 : i32, i32
  }
  func.func @transform_6(%arg0: i32, %arg1: i32) -> (i32, i32, i32, i32) {
    %c0_i32 = arith.constant 0 : i32
    %c0_i32_0 = arith.constant 0 : i32
    %c0_i32_1 = arith.constant 0 : i32
    %c0_i32_2 = arith.constant 0 : i32
    return %arg1, %c0_i32, %c0_i32_0, %c0_i32_1 : i32, i32, i32, i32
  }
  func.func @transform_7(%arg0: i32, %arg1: i32) -> (i32, i32, i32, i32) {
    %c0_i32 = arith.constant 0 : i32
    %c0_i32_0 = arith.constant 0 : i32
    %c0_i32_1 = arith.constant 0 : i32
    %c0_i32_2 = arith.constant 0 : i32
    return %arg1, %c0_i32, %c0_i32_0, %c0_i32_1 : i32, i32, i32, i32
  }
  func.func @transform_8(%arg0: i32, %arg1: i32) -> (i32, i32, i32) {
    %c0_i32 = arith.constant 0 : i32
    %c0_i32_0 = arith.constant 0 : i32
    %c0_i32_1 = arith.constant 0 : i32
    return %arg1, %c0_i32, %c0_i32_0 : i32, i32, i32
  }
  func.func @transform_9(%arg0: i32, %arg1: i32) -> (i32, i32, i32) {
    %c0_i32 = arith.constant 0 : i32
    %c0_i32_0 = arith.constant 0 : i32
    %c0_i32_1 = arith.constant 0 : i32
    return %arg1, %c0_i32, %c0_i32_0 : i32, i32, i32
  }
  func.func @transform_10(%arg0: i32, %arg1: i32) -> (i32, i32, i32) {
    %c0_i32 = arith.constant 0 : i32
    %c0_i32_0 = arith.constant 0 : i32
    %c0_i32_1 = arith.constant 0 : i32
    return %arg1, %c0_i32, %c0_i32_0 : i32, i32, i32
  }
  func.func @transform_11(%arg0: i32, %arg1: i32) -> (i32, i32, i32) {
    %c0_i32 = arith.constant 0 : i32
    %c0_i32_0 = arith.constant 0 : i32
    %c0_i32_1 = arith.constant 0 : i32
    return %arg1, %c0_i32, %c0_i32_0 : i32, i32, i32
  }
  func.func @transform_12(%arg0: i32, %arg1: i32) -> (i32, i32, i32) {
    %c0_i32 = arith.constant 0 : i32
    %c0_i32_0 = arith.constant 0 : i32
    %c0_i32_1 = arith.constant 0 : i32
    return %arg1, %c0_i32, %c0_i32_0 : i32, i32, i32
  }
  func.func @transform_13(%arg0: i32, %arg1: i32) -> (i32, i32, i32, i32) {
    %c0_i32 = arith.constant 0 : i32
    %c0_i32_0 = arith.constant 0 : i32
    %c0_i32_1 = arith.constant 0 : i32
    %c0_i32_2 = arith.constant 0 : i32
    return %arg1, %c0_i32, %c0_i32_0, %c0_i32_1 : i32, i32, i32, i32
  }
  func.func @transform_14(%arg0: i32, %arg1: i32) -> (i32, i32, i32) {
    %c0_i32 = arith.constant 0 : i32
    %c0_i32_0 = arith.constant 0 : i32
    %c0_i32_1 = arith.constant 0 : i32
    return %arg1, %c0_i32, %c0_i32_0 : i32, i32, i32
  }
  func.func @transform_15(%arg0: i32, %arg1: i32) -> (i32, i32, i32, i32) {
    %c0_i32 = arith.constant 0 : i32
    %c0_i32_0 = arith.constant 0 : i32
    %c0_i32_1 = arith.constant 0 : i32
    %c0_i32_2 = arith.constant 0 : i32
    return %arg1, %c0_i32, %c0_i32_0, %c0_i32_1 : i32, i32, i32, i32
  }
  func.func @transform_16(%arg0: i32, %arg1: i32) -> (i32, i32, i32) {
    %c0_i32 = arith.constant 0 : i32
    %c0_i32_0 = arith.constant 0 : i32
    %c0_i32_1 = arith.constant 0 : i32
    return %arg1, %c0_i32, %c0_i32_0 : i32, i32, i32
  }
  func.func @transform_17(%arg0: i32, %arg1: i32) -> (i32, i32) {
    %c0_i32 = arith.constant 0 : i32
    %c0_i32_0 = arith.constant 0 : i32
    %c0_i32_1 = arith.constant 0 : i32
    return %c0_i32, %c0_i32_0 : i32, i32
  }
  func.func @transform_18(%arg0: i32, %arg1: i32) -> (i32, i32) {
    %c0_i32 = arith.constant 0 : i32
    %c0_i32_0 = arith.constant 0 : i32
    %c0_i32_1 = arith.constant 0 : i32
    return %c0_i32, %c0_i32_0 : i32, i32
  }
  func.func @transform_19(%arg0: i32, %arg1: i32) -> (i32, i32, i32) {
    %c0_i32 = arith.constant 0 : i32
    %c0_i32_0 = arith.constant 0 : i32
    %c0_i32_1 = arith.constant 0 : i32
    return %arg0, %c0_i32, %c0_i32_0 : i32, i32, i32
  }
  func.func @transform_20(%arg0: i32, %arg1: i32) -> (i32, i32, i32) {
    %c0_i32 = arith.constant 0 : i32
    %c0_i32_0 = arith.constant 0 : i32
    %c0_i32_1 = arith.constant 0 : i32
    return %arg0, %c0_i32, %c0_i32_0 : i32, i32, i32
  }
}

</mosaic_0001>

<bundles_post_ra>
// kernel: tpu_custom_call.1
= control target key start
LH: loop header
LB: loop body
LE: loop exit
PB: predicated region body
PF: predicated region fallthrough
CT: control target
= control target key end

     0   :  { %s4481_s0 = inlined_call_operand.vmem [shape: f32[2,8,32], index: 0, kind: input, shape index: {}]   ;;  %s4482_s1 = inlined_call_operand.vmem [shape: f32[2,10,32], index: 1, kind: input, shape index: {}]   ;;  %s4483_s2 = inlined_call_operand.vmem [shape: f32[2,8,8], index: 2, kind: input, shape index: {}]   ;;  %s4484_s3 = inlined_call_operand.vmem [shape: f32[2,1,10], index: 3, kind: input, shape index: {}]   ;;  %s4485_s4 = inlined_call_operand.vmem [shape: f32[1,8,32], index: 4, kind: input, shape index: {}]   ;;  %s4486_s5 = inlined_call_operand.vmem [shape: bf16[32,32], index: 5, kind: input, shape index: {}]   ;;  %s4487_s6 = inlined_call_operand.vmem [shape: f32[2,3,1,32], index: 6, kind: input, shape index: {}]   ;;  %s4488_s7 = inlined_call_operand.vmem [shape: f32[2,3,1,32], index: 7, kind: input, shape index: {}]   ;;  %s4489_s8 = inlined_call_operand.vmem [shape: bf16[2,32,96], index: 8, kind: input, shape index: {}]   ;;  %s4490_s9 = inlined_call_operand.vmem [shape: bf16[2,32,32], index: 9, kind: input, shape index: {}]   ;;  %s4491_s10 = inlined_call_operand.vmem [shape: bf16[2,32,32], index: 10, kind: input, shape index: {}]   ;;  %s4492_s11 = inlined_call_operand.vmem [shape: bf16[2,32,64], index: 11, kind: input, shape index: {}]   ;;  %s4493_s12 = inlined_call_operand.vmem [shape: bf16[2,32,32], index: 12, kind: input, shape index: {}]   ;;  %s4494_s13 = inlined_call_operand.vmem [shape: bf16[2,3,32,64], index: 13, kind: input, shape index: {}]   ;;  %s4495_s14 = inlined_call_operand.vmem [shape: f32[2,1,64], index: 14, kind: input, shape index: {}]   ;;  %s4496_s15 = inlined_call_operand.vmem [shape: bf16[2,3,64,32], index: 15, kind: input, shape index: {}]   ;;  %s4497_s16 = inlined_call_operand.vmem [shape: f32[2,1,32], index: 16, kind: input, shape index: {}]   ;;  %s4498_s17 = inlined_call_operand.vmem [shape: f32[1,32], index: 17, kind: input, shape index: {}]   ;;  %s4499_s18 = inlined_call_operand.vmem [shape: f32[1,32], index: 18, kind: input, shape index: {}]   ;;  %s4500_s19 = inlined_call_operand.hbm [shape: f32[2,8,128], index: 19, kind: output, shape index: {0}]   ;;  %s4501_s20 = inlined_call_operand.hbm [shape: f32[2,8,128], index: 20, kind: output, shape index: {1}]  }
   0x1   :  { %4523 = sst [smem:[#allocation25_spill]] %s4481_s0 }
   0x2   :  { %4524 = sst [smem:[#allocation26_spill]] %s4482_s1 }
   0x3   :  { %4525 = sst [smem:[#allocation27_spill]] %s4483_s2 }
   0x4   :  { %4526 = sst [smem:[#allocation28_spill]] %s4484_s3 }
   0x5   :  { %4527 = sst [smem:[#allocation29_spill]] %s4485_s4 }
   0x6   :  { %4528 = sst [smem:[#allocation30_spill]] %s4486_s5 }
   0x7   :  { %4529 = sst [smem:[#allocation31_spill]] %s4487_s6 }
   0x8   :  { %4530 = sst [smem:[#allocation32_spill]] %s4488_s7 }
   0x9   :  { %4531 = sst [smem:[#allocation33_spill]] %s4489_s8 }
   0xa   :  { %4532 = sst [smem:[#allocation34_spill]] %s4490_s9 }
   0xb   :  { %4533 = sst [smem:[#allocation35_spill]] %s4491_s10 }
   0xc   :  { %4534 = sst [smem:[#allocation36_spill]] %s4492_s11 }
   0xd   :  { %4535 = sst [smem:[#allocation37_spill]] %s4493_s12 }
   0xe   :  { %4536 = sst [smem:[#allocation38_spill]] %s4494_s13 }
   0xf   :  { %4537 = sst [smem:[#allocation39_spill]] %s4496_s15 }
  0x10   :  { %4538 = sst [smem:[#allocation40_spill]] %s4497_s16 }
  0x11   :  { %4539 = sst [smem:[#allocation41_spill]] %s4498_s17 }
  0x12   :  { %4540 = sst [smem:[#allocation42_spill]] %s4499_s18 }
  0x13   :  { %4541 = sst [smem:[#allocation43_spill]] %s4500_s19 }
  0x14   :  { %4542 = sst [smem:[#allocation44_spill]] %s4501_s20 }
  0x15   :  { %26 = vsyncpa [#allocation4], 0 }
  0x16   :  { %28 = vsyncpa [#allocation4 + $0x1], 0 }
  0x17   :  { %29 = vsyncpa [#allocation6], 0 }
  0x18   :  { %31 = vsyncpa [#allocation6 + $0x1], 0  ;;  %s3906_s1 = smov 0   ;;  %s3908_s22 = smov 0  }
  0x19   :  { %s3910_s23 = smov 0   ;;  %s3912_s24 = smov 0  }
  0x1a   :  { %s3914_s2 = smov 0   ;;  %s3916_s25 = smov 0  }
  0x1b   :  { %s3918_s3 = smov 0   ;;  %s3920_s26 = smov 0  }
  0x1c LB: > { %4543 = sst [smem:[#allocation9_spill]] %s3757_s1  ;;  %s3110_s27 = sadd.s32 4294967295, %s3785_s26   ;;  %s3785_s26 = sphi %s3920_s26, %s37_s26   ;;  %s3781_s3 = sphi %s3918_s3, %s4602_s3   ;;  %s3777_s25 = sphi %s3916_s25, %s4601_s25   ;;  %s3773_s2 = sphi %s3914_s2, %s4600_s2   ;;  %s3769_s24 = sphi %s3912_s24, %s4599_s24   ;;  %s3765_s23 = sphi %s3910_s23, %s4598_s23   ;;  %s3761_s22 = sphi %s3908_s22, %s4597_s22   ;;  %s3757_s1 = sphi %s3906_s1, %s4596_s1  }
  0x1d   : > { %4544 = sst [smem:[#allocation10_spill]] %s3761_s22  ;;  %s3111_s28 = sadd.s32 4294967294, %s3785_s26  }
  0x1e   : > { %4545 = sst [smem:[#allocation11_spill]] %s3765_s23  ;;  %s46_s4 = sadd.s32 1, %s3777_s25 }
  0x1f   : > { %4546 = sst [smem:[#allocation12_spill]] %s3769_s24  ;;  %p47_p0 = scmp.ge.s32.totalorder %s46_s4, 2 }
  0x20   : > { %4547 = sst [smem:[#allocation13_spill]] %s3773_s2  ;;  %s49_s29 = sadd.s32 1, %s3781_s3 }
  0x21   : > { %4548 = sst [smem:[#allocation14_spill]] %s3777_s25  ;;  %p540_p1 = scmp.ne.s32.totalorder %s3765_s23, %s3761_s22 }
  0x22   : > { %4549 = sst [smem:[#allocation15_spill]] %s3781_s3  ;;  %p541_p2 = scmp.eq.s32.totalorder %s3110_s27, 3 }
  0x23   : > { %4550 = sst [smem:[#allocation16_spill]] %s3785_s26  ;;  %s4604_s4 = smov (%p47_p0, %s46_s4), 0 }
  0x24   : > { %4551 = sst [smem:[#allocation17_spill]] %s4604_s4  ;;  %s4606_s29 = smov (!%p47_p0, %s49_s29), %s3781_s3 }
  0x25   : > { %p3955_p3 = por %p541_p2, %p540_p1  ;;  %p546_p4 = scmp.ne.s32.totalorder %s3761_s22, %s3757_s1 }
  0x26   : > { %p51_p5 = scmp.ge.s32.totalorder %s4606_s29, 2  ;;  %p547_p6 = scmp.eq.s32.totalorder %s3111_s28, 3 }
  0x27   : > { %s4552_s30 = scalar_select %p3955_p3, 1, 0 }
  0x28   : > { %p3114_p7 = scmp.ge.s32.totalorder %s3785_s26, 1  ;;  %p713_p8 = scmp.lt.s32.totalorder %s3785_s26, 5 }
  0x29   : > { %4553 = sst [smem:[#allocation18_spill]] %s4552_s30  ;;  %s4608_s29 = smov (%p51_p5, %s4606_s29), 0 }
  0x2a   : > { %4554 = sst [smem:[#allocation19_spill]] %s4608_s29  ;;  %p3965_p9 = por %p547_p6, %p546_p4 }
  0x2b   : > { %p714_p10 = pnand %p3114_p7, %p713_p8  ;;  %s527_s21 = ssub.s32 %s3781_s3, %s4608_s29 }
  0x2c   : > { %s4555_s0 = scalar_select %p3965_p9, 1, 0 }
  0x2d   : > { %s530_s27 = sadd.s32 1, %s3765_s23  ;;  %p528_p11 = scmp.eq.s32.totalorder %s527_s21, 0 }
  0x2e   : > { %4556 = sst [smem:[#allocation20_spill]] %s4555_s0  ;;  %717 = sbr.rel (%p714_p10) target bundleno = 4880 (0x1310), region = 96 }
  0x2f   : > { %s3973_s4 = scalar_select %p528_p11, %s3765_s23, %s530_s27  }
  0x31   : > { %4557 = sst [smem:[#allocation21_spill]] %s3973_s4 }
  0x33   : > { %s3976_s28 = sand.u32 1, %s3761_s22   ;;  %p836_p12 = scmp.lt.s32.totalorder %s3773_s2, 1 }
  0x34   : > { %4558 = sst [smem:[#allocation22_spill]] %s3976_s28  ;;  %s3115_s25 = sshll.u32 %s3976_s28, 3 }
  0x35   : > { %p852_p13 = scmp.lt.s32.totalorder %s3769_s24, 1  ;;  %s4560_s23 = sld [smem:[#allocation25_spill]] }
  0x36   : > { %s3982_s1 = scalar_select %p836_p12, %s3773_s2, 1 }
  0x37   : > { %s3985_s21 = scalar_select %p852_p13, %s3769_s24, 1 }
  0x38   : > { %4559 = sst [smem:[#allocation23_spill]] %s3982_s1  ;;  %s3117_s27 = sshll.u32 %s3982_s1, 3 }
  0x39   : > { %s3210_s29 = sshll.u32 %s3982_s1, 4  ;;  %s4561_s20 = sld [smem:[#allocation26_spill]] }
  0x3a   : > { %s4562_s2 = sld [smem:[#allocation27_spill]]  ;;  %s3494_s16 = smul.u32 3, %s3985_s21 }
  0x3b   : > { %s839_s22 = scalar_lea.vmem %s4560_s23, %s3117_s27  ;;  %s3211_s13 = sshll.u32 %s3985_s21, 4 }
  0x3c   : > { %s4564_s8 = sld [smem:[#allocation33_spill]]  ;;  %s3495_s0 = smul.u32 48, %s3985_s21 }
  0x3d   : > { %s4565_s9 = sld [smem:[#allocation34_spill]]  ;;  %s3496_s5 = smul.u32 96, %s3985_s21 }
  0x3e   : > { %s4566_s6 = sld [smem:[#allocation31_spill]] }
  0x3f   : > { %s3995_s19 = scalar_lea.vmem %s4561_s20, %s3210_s29  ;;  %s4567_s7 = sld [smem:[#allocation32_spill]] }
  0x40   : > { %s4000_s18 = scalar_lea.vmem %s4562_s2, %s3117_s27  ;;  %s4568_s10 = sld [smem:[#allocation35_spill]] }
  0x41   : > { %s4570_s11 = sld [smem:[#allocation36_spill]]  ;;  %s4063_s20 = scalar_lea.vmem [#allocation3], %s3115_s25 }
  0x42   : > { %s4011_s23 = scalar_lea.vmem %s4564_s8, %s3211_s13  ;;  %s4571_s12 = sld [smem:[#allocation37_spill]] }
  0x43   : > { %s4016_s29 = scalar_lea.vmem %s4565_s9, %s3211_s13  ;;  %s4572_s27 = sld [smem:[#allocation38_spill]] }
  0x44   : > { %s4021_s2 = scalar_lea.vmem %s4566_s6, %s3494_s16  ;;  %s4573_s4 = sld [smem:[#allocation40_spill]] }
  0x45   : > { %s4026_s17 = scalar_lea.vmem %s4567_s7, %s3494_s16  ;;  %s892_s16 = scalar_lea.vmem %s4495_s14, %s3985_s21 }
  0x46   : > { %s4031_s3 = scalar_lea.vmem %s4568_s10, %s3211_s13  ;;  %s4574_s8 = sld [smem:[#allocation39_spill]] }
  0x47   : > { %4569 = sst [smem:[#allocation24_spill]] %s4031_s3  ;;  %s4036_s26 = scalar_lea.vmem %s4570_s11, %s3211_s13 }
  0x48   : > { %s4041_s30 = scalar_lea.vmem %s4571_s12, %s3211_s13  ;;  %s4065_s12 = scalar_lea.vmem [#allocation5], %s3115_s25 }
  0x49   : > { %s4052_s9 = scalar_lea.vmem %s4572_s27, %s3495_s0  ;;  %s4575_s6 = sld [smem:[#allocation12_spill]] }
  0x4a   : > { %s900_s11 = scalar_lea.vmem %s4573_s4, %s3985_s21 }
  0x4c   : > { %s4061_s13 = scalar_lea.vmem %s4574_s8, %s3496_s5 }
  0x4f   : > { %p3133_p0 = scmp.ne.s32.totalorder %s4575_s6, 0 }
  0x50   : > { %s4576_s0 = sld [smem:[#allocation30_spill]] (!%p3133_p0) }
  0x51   : > { %905 = sbr.rel (%p3133_p0) target bundleno = 294 (0x126), region = 100  ;;  %s4577_s3 = sld [smem:[#allocation29_spill]] (!%p3133_p0) }
  0x56   : > { %v3585_v0 = vld [vmem:[%s4576_s0 + $0x8] sm:$0xff]   ;;  %v3787_v1 = vmov 0.0   ;;  %v3586_v2 = vld [vmem:[%s4576_s0] sm:$0xff]   ;;  %vm3788_vm0 = vmmov 0   ;;  %vm925_vm1 = vcmask 261120  }
  0x57   : > { %3290 = vmatprep.subr.bf16.mxu0 %v3787_v1  ;;  %3294 = vmatprep.mubr.msk.bf16.mxu0 %vm3788_vm0, %v3787_v1  ;;  %v906_v3 = vld [vmem:[%s839_s22] sm:$0xff] }
  0x58   : > { %3291 = vmatpush3.bf16.msra.mxu0 %v3585_v0  ;;  %v907_v4 = vpack.c.bf16 %v906_v3, %v906_v3  ;;  %v912_v5 = vld [vmem:[%s4577_s3] sm:$0xff] }
  0x59   : > { %3292 = vmatprep.subr.bf16.mxu0 %v3787_v1 }
  0x5c   : > { %3293 = vmatpush3.bf16.msra.mxu0 %v3586_v2 }
  0x5f   : > { %3295 = vmatmul.mubr.msk.bf16.vlgmr.msra.gmra.mxu0 %vm925_vm1, %v907_v4 }
 0x11f   : > { %v963_v6 = vpop.f32.mrf.mxu0 }
 0x120   : > { %v964_v7 = vadd.f32 %v963_v6, %v912_v5 }
 0x121   : > { %v3296_v8 = vpop.f32.mrf.mxu0 }
 0x122   : > { %969 = vst.msk [vmem:[#allocation2] sm:$0xff] %vm925_vm1, %v964_v7 }
 0x123   : > { %v966_v9 = vpop.f32.mrf.mxu0 }
 0x125   : > { %v3297_v10 = vpop.f32.mrf.mxu0 }
 0x126 PF: > { %vm1039_vm2 = vcmask 261120   ;;  %v3587_v18 = vld [vmem:[%s4011_s23 + $0x8] sm:$0xff]   ;;  %v3789_v19 = vmov 0.0   ;;  %vm3790_vm3 = vmmov 0   ;;  %v3588_v20 = vld [vmem:[%s4011_s23] sm:$0xff]   ;;  %s3791_s22 = smov 104  }
 0x127   : > { %3298 = vmatprep.subr.bf16.mxu1 %v3789_v19  ;;  %3302 = vmatprep.mubr.msk.bf16.mxu1 %vm3790_vm3, %v3789_v19  ;;  %v3137_v29 = vld [vmem:[%s4021_s2] ss:$0 sm:$0xff]  ;;  %s3792_s23 = smov 120   ;;  %s3793_s5 = smov 112   ;;  %vm1142_vm6 = vcmask 64512   ;;  %vm1386_vm7 = vcmask 1043456  }
 0x128   : > { %3299 = vmatpush3.bf16.msra.mxu1 %v3587_v18  ;;  %3312 = vmatprep.subr.bf16.mxu0 %v3789_v19  ;;  %v3138_v32 = vld [vmem:[%s4026_s17] ss:$0 sm:$0xff]  ;;  %s3794_s27 = smov 96   ;;  %s3796_s15 = smov 8   ;;  %vm1587_vm8 = vcmask 130048   ;;  %vm1589_vm9 = vcmask 195584  }
 0x129   : > { %v4077_v11 = vld [vmem:[#allocation2] sm:$0xff]  ;;  %3300 = vmatprep.subr.bf16.mxu1 %v3789_v19  ;;  %3314 = vmatprep.mubr.msk.bf16.mxu0 %vm3790_vm3, %v3789_v19  ;;  %s3797_s4 = smov 16   ;;  %s3798_s8 = smov 24   ;;  %vm2001_vm12 = vcmask 80896   ;;  %vm2055_vm13 = vcmask 1044480   ;;  %vm2366_vm1 = vcmask 1040384  }
 0x12a   : > { %v1040_v12 = vsel %vm1039_vm2, %v4077_v11, 0.0  ;;  %v1037_v52 = vld [vmem:[%s4000_s18] sm:$0xff]  ;;  %s3795_s18 = smov 64   ;;  %s4580_s28 = sld [smem:[#allocation28_spill]]  ;;  %vm2367_vm0 = vsmask.f32 256 }
 0x12b   : > { %1041 = vadd.xlane.f32.xlu0 %v1040_v12 }
 0x12c   : > { %3301 = vmatpush3.bf16.msra.mxu1 %v3588_v20 }
 0x12d   : > { %3306 = vmatprep.subr.bf16.mxu1 %v3789_v19 }
 0x1b4   : > { %v1042_v13 = vpop.xlane.xlu0 %1041 }
 0x1b5   : > { %v1044_v14 = vmul.f32 0.03125, %v1042_v13 }
 0x1b7   : > { %v1045_v15 = vsub.f32 %v4077_v11, %v1044_v14 }
 0x1b9   : > { %v1046_v16 = vmul.f32 %v1045_v15, %v1045_v15  ;;  %v1058_v30 = vmul.f32 %v3137_v29, %v1045_v15 }
 0x1bb   : > { %v1047_v17 = vsel %vm1039_vm2, %v1046_v16, 0.0 }
 0x1bc   : > { %1048 = vadd.xlane.f32.xlu0 %v1047_v17 }
 0x245   : > { %v1049_v21 = vpop.xlane.xlu0 %1048 }
 0x246   : > { %v1051_v22 = vmul.f32 0.032258064, %v1049_v21 }
 0x248   : > { %3615 = vrsqrt.f32 %v1051_v22  ;;  %vm1061_vm4 = vcmp.eq.f32.partialorder %v1051_v22, inf  ;;  %v1064_v25 = vand.u32 2147483648, %v1051_v22  ;;  %vm1063_vm5 = vcmp.eq.f32.partialorder %v1051_v22, 0.0 }
 0x255   : > { %v3616_v23 = vpop.eup %3615 }
 0x256   : > { %v1060_v24 = vmul.f32 %v3616_v23, %v1051_v22 }
 0x258   : > { %v1062_v26 = vsel %vm1061_vm4, %v1051_v22, %v1060_v24  ;;  %vm4341_vm4 = vmand %vm2366_vm1, %vm2367_vm0 }
 0x259   : > { %v1065_v27 = vsel %vm1063_vm5, %v1064_v25, %v1062_v26  ;;  %vm2582_vm5 = vcmask 523264  }
 0x25a   : > { %v1066_v28 = vadd.f32 1e-06, %v1065_v27 }
 0x25c   : > { %3617 = vrcp.f32 %v1066_v28 }
 0x269   : > { %v3618_v31 = vpop.eup %3617 }
 0x26a   : > { %v1068_v33 = vmul.f32 %v3618_v31, %v1058_v30 }
 0x26c   : > { %v1075_v34 = vadd.f32 %v3138_v32, %v1068_v33 }
 0x26e   : > { %v1076_v35 = vpack.c.bf16 %v1075_v34, %v1075_v34 }
 0x270   : > { %3303 = vmatmul.mubr.msk.bf16.vlgmr.msra.gmra.mxu1 %vm1039_vm2, %v1076_v35 }
 0x271   : > { %3308 = vmatprep.mubr.msk.bf16.mxu1 %vm3790_vm3, %v3789_v19 }
 0x330   : > { %v1126_v36 = vpop.f32.mrf.mxu1 }
 0x331   : > { %v4098_v37 = vpack.c.bf16 %v1126_v36, %v1126_v36 }
 0x332   : > { %v3304_v38 = vpop.f32.mrf.mxu1 }
 0x333   : > { %1138 = vrot.lane.b32.xlu0 %v4098_v37, %s3791_s22  ;;  %1134 = vrot.lane.b32.xlu1 %v4098_v37, %s3792_s23 }
 0x334   : > { %v1129_v39 = vpop.f32.mrf.mxu1 }
 0x336   : > { %v3305_v40 = vpop.f32.mrf.mxu1 }
 0x337   : > { %1136 = vrot.lane.b32.xlu1 %v4098_v37, %s3793_s5 }
 0x33b   : > { %1140 = vrot.lane.b32.xlu1 %v4098_v37, %s3794_s27 }
 0x3a5   : > { %v4108_v41 = vpop.permute.xlu1 %1134  ;;  %v4116_v43 = vpop.permute.xlu0 %1138 }
 0x3a6   : > { %1189 = vrot.lane.b32.xlu1 %v4108_v41, %s3794_s27 }
 0x3a9   : > { %v4112_v42 = vpop.permute.xlu1 %1136 }
 0x3aa   : > { %1237 = vrot.lane.b32.xlu1 %v4112_v42, %s3794_s27 }
 0x3ad   : > { %v1141_v44 = vpop.permute.xlu1 %1140 }
 0x3ae   : > { %v1147_v45 = vsel %vm1142_vm6, %v1141_v44, 0  ;;  %1285 = vrot.lane.b32.xlu1 %v4116_v43, %s3794_s27 }
 0x3af   : > { %3307 = vmatpush3.bf16.xpose.msra.mxu1 %v1147_v45 }
 0x3b0   : > { %3318 = vmatprep.subr.bf16.mxu1 %v3789_v19 }
 0x3b6   : > { %3309 = vmatmul.mubr.msk.bf16.vlgmr.msra.gmra.mxu1 %vm1142_vm6, %v4098_v37 }
 0x3b7   : > { %3320 = vmatprep.mubr.msk.bf16.mxu1 %vm3790_vm3, %v3789_v19 }
 0x418   : > { %v1190_v46 = vpop.permute.xlu1 %1189 }
 0x419   : > { %v1195_v47 = vsel %vm1142_vm6, %v1190_v46, 0 }
 0x41a   : > { %3313 = vmatpush3.bf16.xpose.msra.mxu0 %v1195_v47 }
 0x41b   : > { %3324 = vmatprep.subr.bf16.mxu0 %v3789_v19 }
 0x41c   : > { %v1238_v48 = vpop.permute.xlu1 %1237 }
 0x41d   : > { %v1243_v49 = vsel %vm1142_vm6, %v1238_v48, 0 }
 0x41e   : > { %3319 = vmatpush3.bf16.xpose.msra.mxu1 %v1243_v49 }
 0x41f   : > { %3330 = vmatprep.subr.bf16.mxu1 %v3789_v19 }
 0x420   : > { %v1286_v50 = vpop.permute.xlu1 %1285 }
 0x421   : > { %v1291_v51 = vsel %vm1142_vm6, %v1286_v50, 0  ;;  %3315 = vmatmul.mubr.msk.bf16.vlgmr.msra.gmra.mxu0 %vm1142_vm6, %v4108_v41 }
 0x422   : > { %3325 = vmatpush3.bf16.xpose.msra.mxu0 %v1291_v51  ;;  %3326 = vmatprep.mubr.msk.bf16.mxu0 %vm3790_vm3, %v3789_v19 }
 0x423   : > { %3336 = vmatprep.subr.bf16.mxu0 %v3789_v19 }
 0x425   : > { %3321 = vmatmul.mubr.msk.bf16.vlgmr.msra.gmra.mxu1 %vm1142_vm6, %v4112_v42 }
 0x426   : > { %3332 = vmatprep.mubr.msk.bf16.mxu1 %vm3790_vm3, %v3789_v19 }
 0x429   : > { %3327 = vmatmul.mubr.msk.bf16.vlgmr.msra.gmra.mxu0 %vm1142_vm6, %v4116_v43 }
 0x42a   : > { %3338 = vmatprep.mubr.msk.bf16.mxu0 %vm3790_vm3, %v3789_v19 }
 0x476   : > { %v1183_v53 = vpop.f32.mrf.mxu1 }
 0x477   : > { %v1184_v54 = vadd.f32 %v1183_v53, %v1037_v52 }
 0x478   : > { %v3310_v55 = vpop.f32.mrf.mxu1 }
 0x479   : > { %v1333_v56 = vsel %vm1142_vm6, %v1184_v54, -inf }
 0x47a   : > { %1334 = vmax.xlane.f32.xlu1 %v1333_v56  ;;  %v1186_v57 = vpop.f32.mrf.mxu1 }
 0x47c   : > { %v3311_v58 = vpop.f32.mrf.mxu1 }
 0x4e1   : > { %v1231_v59 = vpop.f32.mrf.mxu0 }
 0x4e2   : > { %v1232_v60 = vadd.f32 %v1231_v59, %v1037_v52 }
 0x4e3   : > { %v3316_v61 = vpop.f32.mrf.mxu0 }
 0x4e4   : > { %v1336_v62 = vsel %vm1142_vm6, %v1232_v60, -inf }
 0x4e5   : > { %1337 = vmax.xlane.f32.xlu0 %v1336_v62  ;;  %v1234_v63 = vpop.f32.mrf.mxu0  ;;  %v1279_v0 = vpop.f32.mrf.mxu1 }
 0x4e6   : > { %v1280_v1 = vadd.f32 %v1279_v0, %v1037_v52  ;;  %v3589_v63 = vld [vmem:[%s4016_s29 + $0x8] sm:$0xff]   ;;  %v3590_v0 = vld [vmem:[%s4016_s29] sm:$0xff]   ;;  %s4578_s29 = sld [smem:[#allocation24_spill]] }
 0x4e7   : > { %v3317_v2 = vpop.f32.mrf.mxu0  ;;  %v3322_v3 = vpop.f32.mrf.mxu1 }
 0x4e8   : > { %v1339_v4 = vsel %vm1142_vm6, %v1280_v1, -inf }
 0x4e9   : > { %v1327_v5 = vpop.f32.mrf.mxu0  ;;  %1340 = vmax.xlane.f32.xlu1 %v1339_v4  ;;  %v1282_v6 = vpop.f32.mrf.mxu1 }
 0x4ea   : > { %v1328_v7 = vadd.f32 %v1327_v5, %v1037_v52 }
 0x4eb   : > { %v3323_v8 = vpop.f32.mrf.mxu1  ;;  %v3328_v9 = vpop.f32.mrf.mxu0 }
 0x4ec   : > { %v1342_v10 = vsel %vm1142_vm6, %v1328_v7, -inf }
 0x4ed   : > { %1343 = vmax.xlane.f32.xlu0 %v1342_v10  ;;  %v1330_v12 = vpop.f32.mrf.mxu0 }
 0x4ef   : > { %v3329_v13 = vpop.f32.mrf.mxu0 }
 0x4fa   : > { %1381 = vrot.lane.b32.xlu1 %v4098_v37, %s3795_s18 }
 0x503   : > { %v1335_v14 = vpop.xlane.xlu1 %1334 }
 0x504   : > { %v1345_v15 = vsub.f32 %v1184_v54, %v1335_v14 }
 0x506   : > { %v1349_v16 = vmul.f32 1.442695, %v1345_v15 }
 0x508   : > { %3619 = vpow2.f32 %v1349_v16 }
 0x515   : > { %v3620_v17 = vpop.eup %3619 }
 0x516   : > { %v1357_v18 = vsel %vm1142_vm6, %v3620_v17, 0.0 }
 0x51e   : > { %1358 = vadd.xlane.f32.xlu1 %v1357_v18 }
 0x56e   : > { %v1338_v20 = vpop.xlane.xlu0 %1337 }
 0x56f   : > { %v1346_v21 = vsub.f32 %v1232_v60, %v1338_v20 }
 0x571   : > { %v1351_v22 = vmul.f32 1.442695, %v1346_v21 }
 0x572   : > { %v1341_v23 = vpop.xlane.xlu1 %1340 }
 0x573   : > { %3621 = vpow2.f32 %v1351_v22  ;;  %v1347_v24 = vsub.f32 %v1280_v1, %v1341_v23 }
 0x575   : > { %v1353_v25 = vmul.f32 1.442695, %v1347_v24 }
 0x576   : > { %v1344_v26 = vpop.xlane.xlu0 %1343  ;;  %v1382_v27 = vpop.permute.xlu1 %1381 }
 0x577   : > { %3623 = vpow2.f32 %v1353_v25  ;;  %v1348_v28 = vsub.f32 %v1328_v7, %v1344_v26  ;;  %v1388_v29 = vsel %vm1386_vm7, %v1382_v27, 0 }
 0x578   : > { %3331 = vmatpush3.bf16.msra.mxu1 %v1388_v29 }
 0x579   : > { %v1355_v30 = vmul.f32 1.442695, %v1348_v28  ;;  %3342 = vmatprep.subr.bf16.mxu1 %v3789_v19 }
 0x57b   : > { %3625 = vpow2.f32 %v1355_v30 }
 0x580   : > { %v3622_v31 = vpop.eup %3621 }
 0x581   : > { %v1360_v32 = vsel %vm1142_vm6, %v3622_v31, 0.0 }
 0x582   : > { %1361 = vadd.xlane.f32.xlu0 %v1360_v32 }
 0x584   : > { %v3624_v33 = vpop.eup %3623 }
 0x585   : > { %v1363_v34 = vsel %vm1142_vm6, %v3624_v33, 0.0 }
 0x586   : > { %1364 = vadd.xlane.f32.xlu1 %v1363_v34  ;;  %v1035_v34 = vld [vmem:[%s3995_s19] sm:$0xff] }
 0x588   : > { %v3626_v35 = vpop.eup %3625 }
 0x589   : > { %v1366_v36 = vsel %vm1142_vm6, %v3626_v35, 0.0 }
 0x58a   : > { %1367 = vadd.xlane.f32.xlu0 %v1366_v36 }
 0x597   : > { %1478 = vrot.lane.b32.xlu1 %v4112_v42, %s3795_s18 }
 0x59b   : > { %1526 = vrot.lane.b32.xlu1 %v4116_v43, %s3795_s18 }
 0x5a0   : > { %1430 = vrot.lane.b32.xlu0 %v4108_v41, %s3795_s18 }
 0x5a7   : > { %v1359_v37 = vpop.xlane.xlu1 %1358 }
 0x5a8   : > { %3627 = vrcp.f32 %v1359_v37  ;;  %v3593_v37 = vld [vmem:[%s4578_s29 + $0x8] sm:$0xff]  }
 0x5b5   : > { %v3628_v38 = vpop.eup %3627 }
 0x5b6   : > { %v1373_v39 = vmul.f32 %v3628_v38, %v3620_v17  ;;  %v3594_v38 = vld [vmem:[%s4578_s29] sm:$0xff]  }
 0x5b8   : > { %v1377_v40 = vpack.c.bf16 %v1373_v39, %v1373_v39 }
 0x5ba   : > { %3333 = vmatmul.mubr.msk.bf16.vlgmr.msra.gmra.mxu1 %vm1142_vm6, %v1377_v40 }
 0x5bb   : > { %3344 = vmatprep.mubr.msk.bf16.mxu1 %vm3790_vm3, %v3789_v19 }
 0x60b   : > { %v1362_v44 = vpop.xlane.xlu0 %1361 }
 0x60c   : > { %3629 = vrcp.f32 %v1362_v44 }
 0x60f   : > { %v1365_v45 = vpop.xlane.xlu1 %1364 }
 0x610   : > { %3631 = vrcp.f32 %v1365_v45 }
 0x613   : > { %v1368_v42 = vpop.xlane.xlu0 %1367  ;;  %v1479_v46 = vpop.permute.xlu1 %1478 }
 0x614   : > { %3633 = vrcp.f32 %v1368_v42  ;;  %v1484_v43 = vsel %vm1386_vm7, %v1479_v46, 0 }
 0x615   : > { %3343 = vmatpush3.bf16.msra.mxu1 %v1484_v43 }
 0x616   : > { %3354 = vmatprep.subr.bf16.mxu1 %v3789_v19 }
 0x617   : > { %v1431_v41 = vpop.permute.xlu0 %1430  ;;  %v1527_v50 = vpop.permute.xlu1 %1526 }
 0x618   : > { %v1436_v47 = vsel %vm1386_vm7, %v1431_v41, 0  ;;  %v1532_v53 = vsel %vm1386_vm7, %v1527_v50, 0  ;;  %v3154_v50 = vld [vmem:[%s4026_s17 + $0x1] ss:$0 sm:$0xff] }
 0x619   : > { %v3630_v48 = vpop.eup %3629  ;;  %3337 = vmatpush3.bf16.msra.mxu0 %v1436_v47  ;;  %v3153_v47 = vld [vmem:[%s4021_s2 + $0x1] ss:$0 sm:$0xff] }
 0x61a   : > { %3348 = vmatprep.subr.bf16.mxu0 %v3789_v19  ;;  %v1374_v49 = vmul.f32 %v3630_v48, %v3622_v31 }
 0x61c   : > { %v1378_v51 = vpack.c.bf16 %v1374_v49, %v1374_v49 }
 0x61d   : > { %v3632_v52 = vpop.eup %3631 }
 0x61e   : > { %3339 = vmatmul.mubr.msk.bf16.vlgmr.msra.gmra.mxu0 %vm1142_vm6, %v1378_v51  ;;  %v1375_v54 = vmul.f32 %v3632_v52, %v3624_v33  ;;  %v3592_v33 = vld [vmem:[%s4036_s26] sm:$0xff]  }
 0x61f   : > { %3349 = vmatpush3.bf16.msra.mxu0 %v1532_v53  ;;  %3350 = vmatprep.mubr.msk.bf16.mxu0 %vm3790_vm3, %v3789_v19 }
 0x620   : > { %v1379_v55 = vpack.c.bf16 %v1375_v54, %v1375_v54  ;;  %3362 = vmatprep.subr.bf16.mxu0 %v3789_v19 }
 0x621   : > { %v3634_v56 = vpop.eup %3633 }
 0x622   : > { %3345 = vmatmul.mubr.msk.bf16.vlgmr.msra.gmra.mxu1 %vm1142_vm6, %v1379_v55  ;;  %v1376_v57 = vmul.f32 %v3634_v56, %v3626_v35  ;;  %v1036_v35 = vld [vmem:[%s3995_s19 + $0x8] sm:$0x3]  ;;  %s4579_s19 = sld [smem:[#allocation23_spill]] }
 0x623   : > { %3358 = vmatprep.mubr.msk.bf16.mxu1 %vm3790_vm3, %v3789_v19  ;;  %3355 = vmatpush3.bf16.msra.mxu1 %v3589_v63  ;;  %v1738_v36 = vpack.c.bf16 %v1036_v35, %v1035_v34 }
 0x624   : > { %v1380_v58 = vpack.c.bf16 %v1376_v57, %v1376_v57  ;;  %3356 = vmatprep.subr.bf16.mxu1 %v3789_v19 }
 0x626   : > { %3351 = vmatmul.mubr.msk.bf16.vlgmr.msra.gmra.mxu0 %vm1142_vm6, %v1380_v58 }
 0x627   : > { %3366 = vmatprep.mubr.msk.bf16.mxu0 %vm3790_vm3, %v3789_v19  ;;  %3357 = vmatpush3.bf16.msra.mxu1 %v3590_v0 }
 0x628   : > { %3370 = vmatprep.subr.bf16.mxu1 %v3789_v19  ;;  %3363 = vmatpush3.bf16.msra.mxu0 %v3593_v37  ;;  %s4581_s7 = scalar_lea.vmem %s4580_s28, %s4579_s19 }
 0x629   : > { %3364 = vmatprep.subr.bf16.mxu0 %v3789_v19 }
 0x62c   : > { %3365 = vmatpush3.bf16.msra.mxu0 %v3594_v38 }
 0x62d   : > { %3378 = vmatprep.subr.bf16.mxu0 %v3789_v19 }
 0x67a   : > { %v1424_v59 = vpop.f32.mrf.mxu1 }
 0x67c   : > { %v3334_v60 = vpop.f32.mrf.mxu1 }
 0x67e   : > { %v1427_v61 = vpop.f32.mrf.mxu1 }
 0x680   : > { %v3335_v62 = vpop.f32.mrf.mxu1 }
 0x6de   : > { %v1472_v1 = vpop.f32.mrf.mxu0 }
 0x6df   : > { %1575 = vrot.lane.b32.xlu0 %v1472_v1, %s3796_s15 }
 0x6e0   : > { %v3340_v2 = vpop.f32.mrf.mxu0 }
 0x6e2   : > { %v1475_v3 = vpop.f32.mrf.mxu0  ;;  %v1520_v4 = vpop.f32.mrf.mxu1 }
 0x6e3   : > { %1579 = vrot.lane.b32.xlu1 %v1520_v4, %s3797_s4 }
 0x6e4   : > { %v3341_v5 = vpop.f32.mrf.mxu0  ;;  %v3346_v6 = vpop.f32.mrf.mxu1 }
 0x6e6   : > { %v1523_v7 = vpop.f32.mrf.mxu1  ;;  %v1568_v8 = vpop.f32.mrf.mxu0 }
 0x6e7   : > { %1583 = vrot.lane.b32.xlu0 %v1568_v8, %s3798_s8 }
 0x6e8   : > { %v3347_v9 = vpop.f32.mrf.mxu1  ;;  %v3352_v10 = vpop.f32.mrf.mxu0 }
 0x6e9   : > { %v3161_v10 = vld [vmem:[%s4581_s7] ss:$0 sm:$0xff] }
 0x6ea   : > { %v1571_v12 = vpop.f32.mrf.mxu0 }
 0x6ec   : > { %v3353_v13 = vpop.f32.mrf.mxu0 }
 0x751   : > { %v1576_v14 = vpop.permute.xlu0 %1575 }
 0x752   : > { %v1586_v16 = vsel %vm1142_vm6, %v1424_v59, %v1576_v14 }
 0x755   : > { %v1580_v15 = vpop.permute.xlu1 %1579 }
 0x756   : > { %v1588_v17 = vsel %vm1587_vm8, %v1586_v16, %v1580_v15 }
 0x759   : > { %v1584_v18 = vpop.permute.xlu0 %1583 }
 0x75a   : > { %v1590_v20 = vsel %vm1589_vm9, %v1588_v17, %v1584_v18 }
 0x75b   : > { %v1591_v21 = vpack.c.bf16 %v1590_v20, %v1590_v20 }
 0x75d   : > { %3359 = vmatmul.mubr.msk.bf16.vlgmr.msra.gmra.mxu1 %vm1039_vm2, %v1591_v21 }
 0x75e   : > { %3374 = vmatprep.mubr.msk.bf16.mxu1 %vm3790_vm3, %v3789_v19 }
 0x81d   : > { %v1641_v22 = vpop.f32.mrf.mxu1 }
 0x81e   : > { %v4195_v23 = vadd.f32 %v1641_v22, %v4077_v11  ;;  %v3591_v11 = vld [vmem:[%s4036_s26 + $0x8] sm:$0xff]  }
 0x81f   : > { %v3360_v24 = vpop.f32.mrf.mxu1  ;;  %3371 = vmatpush3.bf16.msra.mxu1 %v3591_v11 }
 0x820   : > { %v1648_v25 = vsel %vm1039_vm2, %v4195_v23, 0.0  ;;  %3372 = vmatprep.subr.bf16.mxu1 %v3789_v19 }
 0x821   : > { %1649 = vadd.xlane.f32.xlu1 %v1648_v25  ;;  %v1644_v26 = vpop.f32.mrf.mxu1 }
 0x823   : > { %v3361_v27 = vpop.f32.mrf.mxu1  ;;  %3373 = vmatpush3.bf16.msra.mxu1 %v3592_v33 }
 0x824   : > { %3384 = vmatprep.subr.bf16.mxu1 %v3789_v19 }
 0x826   : > { %3375 = vmatmul.mubr.msk.bf16.vlgmr.msra.gmra.mxu1 %vm1039_vm2, %v1738_v36 }
 0x827   : > { %3386 = vmatprep.mubr.msk.bf16.mxu1 %vm3790_vm3, %v3789_v19 }
 0x8aa   : > { %v1650_v28 = vpop.xlane.xlu1 %1649 }
 0x8ab   : > { %v1651_v29 = vmul.f32 0.03125, %v1650_v28 }
 0x8ad   : > { %v1652_v30 = vsub.f32 %v4195_v23, %v1651_v29 }
 0x8af   : > { %v1653_v31 = vmul.f32 %v1652_v30, %v1652_v30  ;;  %v1664_v48 = vmul.f32 %v3153_v47, %v1652_v30 }
 0x8b1   : > { %v1654_v32 = vsel %vm1039_vm2, %v1653_v31, 0.0 }
 0x8b2   : > { %1655 = vadd.xlane.f32.xlu0 %v1654_v32 }
 0x8e6   : > { %v1788_v54 = vpop.f32.mrf.mxu1 }
 0x8e8   : > { %v3376_v55 = vpop.f32.mrf.mxu1 }
 0x8ea   : > { %v1791_v56 = vpop.f32.mrf.mxu1 }
 0x8eb   : > { %v4219_v57 = vpack.c.bf16 %v1791_v56, %v1788_v54 }
 0x8ec   : > { %v3377_v58 = vpop.f32.mrf.mxu1 }
 0x8ed   : > { %1805 = vrot.lane.b32.xlu0 %v4219_v57, %s3792_s23  ;;  %1807 = vrot.lane.b32.xlu1 %v4219_v57, %s3793_s5  ;;  %v1821_v59 = vsel %vm1142_vm6, %v4219_v57, 0 }
 0x8f1   : > { %1809 = vrot.lane.b32.xlu0 %v4219_v57, %s3791_s22 }
 0x93b   : > { %v1656_v39 = vpop.xlane.xlu0 %1655 }
 0x93c   : > { %v1657_v40 = vmul.f32 0.032258064, %v1656_v39 }
 0x93e   : > { %3635 = vrsqrt.f32 %v1657_v40  ;;  %vm1667_vm10 = vcmp.eq.f32.partialorder %v1657_v40, inf  ;;  %v1670_v42 = vand.u32 2147483648, %v1657_v40  ;;  %vm1669_vm11 = vcmp.eq.f32.partialorder %v1657_v40, 0.0 }
 0x94b   : > { %v3636_v44 = vpop.eup %3635 }
 0x94c   : > { %v1666_v45 = vmul.f32 %v3636_v44, %v1657_v40 }
 0x94e   : > { %v1668_v46 = vsel %vm1667_vm10, %v1657_v40, %v1666_v45 }
 0x94f   : > { %v1671_v43 = vsel %vm1669_vm11, %v1670_v42, %v1668_v46 }
 0x950   : > { %v1672_v41 = vadd.f32 1e-06, %v1671_v43 }
 0x952   : > { %3637 = vrcp.f32 %v1672_v41 }
 0x95f   : > { %v3638_v49 = vpop.eup %3637  ;;  %v4230_v60 = vpop.permute.xlu0 %1805 }
 0x960   : > { %v1674_v51 = vmul.f32 %v3638_v49, %v1664_v48  ;;  %v1867_v61 = vsel %vm1142_vm6, %v4230_v60, 0  ;;  %v4235_v62 = vpop.permute.xlu1 %1807 }
 0x961   : > { %3385 = vmatpush3.bf16.xpose.msra.mxu1 %v1867_v61  ;;  %v1913_v2 = vsel %vm1142_vm6, %v4235_v62, 0 }
 0x962   : > { %v1681_v52 = vadd.f32 %v3154_v50, %v1674_v51  ;;  %3396 = vmatprep.subr.bf16.mxu1 %v3789_v19 }
 0x963   : > { %v4246_v5 = vpop.permute.xlu0 %1809 }
 0x964   : > { %v1682_v53 = vpack.c.bf16 %v1681_v52, %v1681_v52  ;;  %v1959_v7 = vsel %vm1142_vm6, %v4246_v5, 0 }
 0x966   : > { %3367 = vmatmul.mubr.msk.bf16.vlgmr.msra.gmra.mxu0 %vm1039_vm2, %v1682_v53 }
 0x967   : > { %3380 = vmatprep.mubr.msk.bf16.mxu0 %vm3790_vm3, %v3789_v19  ;;  %3379 = vmatpush3.bf16.xpose.msra.mxu0 %v1821_v59 }
 0x968   : > { %3390 = vmatprep.subr.bf16.mxu0 %v3789_v19 }
 0xa26   : > { %v1732_v63 = vpop.f32.mrf.mxu0 }
 0xa27   : > { %v1795_v0 = vpack.c.bf16 %v1732_v63, %v1732_v63 }
 0xa28   : > { %v3368_v1 = vpop.f32.mrf.mxu0 }
 0xa29   : > { %1797 = vrot.lane.b32.xlu1 %v1795_v0, %s3792_s23  ;;  %1801 = vrot.lane.b32.xlu0 %v1795_v0, %s3791_s22 }
 0xa2a   : > { %3381 = vmatmul.mubr.msk.bf16.vlgmr.msra.gmra.mxu0 %vm1142_vm6, %v1795_v0  ;;  %v1735_v3 = vpop.f32.mrf.mxu0 }
 0xa2b   : > { %3391 = vmatpush3.bf16.xpose.msra.mxu0 %v1913_v2  ;;  %3392 = vmatprep.mubr.msk.bf16.mxu0 %vm3790_vm3, %v3789_v19 }
 0xa2c   : > { %v3369_v4 = vpop.f32.mrf.mxu0  ;;  %3402 = vmatprep.subr.bf16.mxu0 %v3789_v19 }
 0xa2d   : > { %1799 = vrot.lane.b32.xlu1 %v1795_v0, %s3793_s5 }
 0xa9b   : > { %v1798_v6 = vpop.permute.xlu1 %1797  ;;  %v1802_v9 = vpop.permute.xlu0 %1801 }
 0xa9c   : > { %3387 = vmatmul.mubr.msk.bf16.vlgmr.msra.gmra.mxu1 %vm1142_vm6, %v1798_v6 }
 0xa9d   : > { %3397 = vmatpush3.bf16.xpose.msra.mxu1 %v1959_v7  ;;  %3398 = vmatprep.mubr.msk.bf16.mxu1 %vm3790_vm3, %v3789_v19 }
 0xa9e   : > { %3408 = vmatprep.subr.bf16.mxu1 %v3789_v19 }
 0xa9f   : > { %v1800_v8 = vpop.permute.xlu1 %1799 }
 0xaa0   : > { %3393 = vmatmul.mubr.msk.bf16.vlgmr.msra.gmra.mxu0 %vm1142_vm6, %v1800_v8 }
 0xaa1   : > { %3404 = vmatprep.mubr.msk.bf16.mxu0 %vm3790_vm3, %v3789_v19 }
 0xaa4   : > { %3399 = vmatmul.mubr.msk.bf16.vlgmr.msra.gmra.mxu1 %vm1142_vm6, %v1802_v9 }
 0xaa5   : > { %3410 = vmatprep.mubr.msk.bf16.mxu1 %vm3790_vm3, %v3789_v19 }
 0xaea   : > { %v1857_v12 = vpop.f32.mrf.mxu0 }
 0xaeb   : > { %v1858_v13 = vadd.f32 %v3161_v10, %v1857_v12 }
 0xaec   : > { %v3382_v14 = vpop.f32.mrf.mxu0 }
 0xaed   : > { %v2002_v15 = vsel %vm2001_vm12, %v1858_v13, -inf  ;;  %v2314_v30 = vsel %vm2001_vm12, %v1858_v13, 0.0 }
 0xaee   : > { %2003 = vmax.xlane.f32.xlu1 %v2002_v15  ;;  %v1860_v16 = vpop.f32.mrf.mxu0 }
 0xaf0   : > { %v3383_v17 = vpop.f32.mrf.mxu0 }
 0xb5c   : > { %v1903_v18 = vpop.f32.mrf.mxu1 }
 0xb5d   : > { %v1904_v20 = vadd.f32 %v3161_v10, %v1903_v18 }
 0xb5e   : > { %v3388_v21 = vpop.f32.mrf.mxu1 }
 0xb5f   : > { %v2005_v22 = vsel %vm2001_vm12, %v1904_v20, -inf  ;;  %v2315_v26 = vsel %vm2001_vm12, %v1904_v20, 0.0 }
 0xb60   : > { %v1949_v24 = vpop.f32.mrf.mxu0  ;;  %2006 = vmax.xlane.f32.xlu0 %v2005_v22  ;;  %v1906_v25 = vpop.f32.mrf.mxu1  ;;  %v2316_v11 = vadd.f32 %v2315_v26, %v2314_v30 }
 0xb61   : > { %v1950_v27 = vadd.f32 %v3161_v10, %v1949_v24 }
 0xb62   : > { %v3389_v28 = vpop.f32.mrf.mxu1  ;;  %v3394_v29 = vpop.f32.mrf.mxu0 }
 0xb63   : > { %v2317_v31 = vsel %vm2001_vm12, %v1950_v27, 0.0  ;;  %v2008_v32 = vsel %vm2001_vm12, %v1950_v27, -inf }
 0xb64   : > { %v1952_v33 = vpop.f32.mrf.mxu0  ;;  %2009 = vmax.xlane.f32.xlu0 %v2008_v32  ;;  %v1995_v34 = vpop.f32.mrf.mxu1  ;;  %v2318_v36 = vadd.f32 %v2317_v31, %v2316_v11  ;;  %v3595_v32 = vld [vmem:[%s4041_s30 + $0x8] sm:$0xff]   ;;  %v3596_v11 = vld [vmem:[%s4041_s30] sm:$0xff]  }
 0xb65   : > { %v1996_v35 = vadd.f32 %v3161_v10, %v1995_v34 }
 0xb66   : > { %v3395_v37 = vpop.f32.mrf.mxu0  ;;  %v3400_v38 = vpop.f32.mrf.mxu1 }
 0xb67   : > { %v2319_v39 = vsel %vm2001_vm12, %v1996_v35, 0.0  ;;  %v2011_v40 = vsel %vm2001_vm12, %v1996_v35, -inf }
 0xb68   : > { %v2320_v44 = vadd.f32 %v2319_v39, %v2318_v36  ;;  %2012 = vmax.xlane.f32.xlu1 %v2011_v40  ;;  %v1998_v45 = vpop.f32.mrf.mxu1 }
 0xb6a   : > { %v4273_v42 = vmul.f32 0.25, %v2320_v44  ;;  %v3401_v46 = vpop.f32.mrf.mxu1 }
 0xb77   : > { %v2004_v43 = vpop.xlane.xlu1 %2003 }
 0xb78   : > { %v2014_v41 = vsub.f32 %v1858_v13, %v2004_v43 }
 0xb79   : > { %2099 = vrot.lane.b32.xlu1 %v4230_v60, %s3794_s27 }
 0xb7a   : > { %2050 = vrot.lane.b32.xlu0 %v4219_v57, %s3794_s27  ;;  %v2018_v47 = vmul.f32 1.442695, %v2014_v41 }
 0xb7c   : > { %3639 = vpow2.f32 %v2018_v47 }
 0xb89   : > { %v3640_v48 = vpop.eup %3639 }
 0xb8a   : > { %v2026_v49 = vsel %vm2001_vm12, %v3640_v48, 0.0 }
 0xb99   : > { %2027 = vadd.xlane.f32.xlu0 %v2026_v49 }
 0xbe9   : > { %v2007_v50 = vpop.xlane.xlu0 %2006 }
 0xbea   : > { %v2015_v51 = vsub.f32 %v1904_v20, %v2007_v50 }
 0xbec   : > { %v2020_v52 = vmul.f32 1.442695, %v2015_v51 }
 0xbed   : > { %v2010_v53 = vpop.xlane.xlu0 %2009 }
 0xbee   : > { %3641 = vpow2.f32 %v2020_v52  ;;  %v2016_v54 = vsub.f32 %v1950_v27, %v2010_v53 }
 0xbf0   : > { %v2022_v55 = vmul.f32 1.442695, %v2016_v54 }
 0xbf1   : > { %v2051_v56 = vpop.permute.xlu0 %2050  ;;  %v2013_v58 = vpop.xlane.xlu1 %2012 }
 0xbf2   : > { %3643 = vpow2.f32 %v2022_v55  ;;  %v2057_v57 = vsel %vm2055_vm13, %v2051_v56, 0  ;;  %v2017_v59 = vsub.f32 %v1996_v35, %v2013_v58 }
 0xbf3   : > { %3403 = vmatpush3.bf16.msra.mxu0 %v2057_v57 }
 0xbf4   : > { %v2024_v60 = vmul.f32 1.442695, %v2017_v59  ;;  %3414 = vmatprep.subr.bf16.mxu0 %v3789_v19 }
 0xbf5   : > { %v2100_v61 = vpop.permute.xlu1 %2099 }
 0xbf6   : > { %3645 = vpow2.f32 %v2024_v60  ;;  %v2105_v63 = vsel %vm2055_vm13, %v2100_v61, 0 }
 0xbf7   : > { %3409 = vmatpush3.bf16.msra.mxu1 %v2105_v63 }
 0xbf8   : > { %3420 = vmatprep.subr.bf16.mxu1 %v3789_v19 }
 0xbfb   : > { %v3642_v0 = vpop.eup %3641 }
 0xbfc   : > { %v2029_v1 = vsel %vm2001_vm12, %v3642_v0, 0.0 }
 0xbfd   : > { %2030 = vadd.xlane.f32.xlu1 %v2029_v1  ;;  %v3597_v1 = vld [vmem:[%s4052_s9 + $0x28] sm:$0xff]  }
 0xbff   : > { %v3644_v2 = vpop.eup %3643 }
 0xc00   : > { %v2032_v3 = vsel %vm2001_vm12, %v3644_v2, 0.0 }
 0xc01   : > { %2033 = vadd.xlane.f32.xlu0 %v2032_v3  ;;  %v3600_v3 = vld [vmem:[%s4052_s9 + $0x10] sm:$0xff]  }
 0xc03   : > { %v3646_v4 = vpop.eup %3645 }
 0xc04   : > { %v2035_v6 = vsel %vm2001_vm12, %v3646_v4, 0.0 }
 0xc05   : > { %2036 = vadd.xlane.f32.xlu1 %v2035_v6 }
 0xc16   : > { %2147 = vrot.lane.b32.xlu1 %v4235_v62, %s3794_s27 }
 0xc17   : > { %2195 = vrot.lane.b32.xlu0 %v4246_v5, %s3794_s27 }
 0xc22   : > { %v2028_v7 = vpop.xlane.xlu0 %2027 }
 0xc23   : > { %3647 = vrcp.f32 %v2028_v7 }
 0xc30   : > { %v3648_v8 = vpop.eup %3647 }
 0xc31   : > { %v2042_v9 = vmul.f32 %v3648_v8, %v3640_v48 }
 0xc33   : > { %v2046_v10 = vpack.c.bf16 %v2042_v9, %v2042_v9 }
 0xc35   : > { %3405 = vmatmul.mubr.msk.bf16.vlgmr.msra.gmra.mxu0 %vm2001_vm12, %v2046_v10 }
 0xc36   : > { %3416 = vmatprep.mubr.msk.bf16.mxu0 %vm3790_vm3, %v3789_v19 }
 0xc86   : > { %v2031_v12 = vpop.xlane.xlu1 %2030 }
 0xc87   : > { %3649 = vrcp.f32 %v2031_v12 }
 0xc8a   : > { %v2034_v13 = vpop.xlane.xlu0 %2033 }
 0xc8b   : > { %3651 = vrcp.f32 %v2034_v13 }
 0xc8e   : > { %v2037_v14 = vpop.xlane.xlu1 %2036  ;;  %v2196_v17 = vpop.permute.xlu0 %2195 }
 0xc8f   : > { %3653 = vrcp.f32 %v2037_v14  ;;  %v2201_v21 = vsel %vm2055_vm13, %v2196_v17, 0  ;;  %v3173_v14 = vld [vmem:[%s4021_s2 + $0x2] ss:$0 sm:$0xff] }
 0xc92   : > { %v2148_v62 = vpop.permute.xlu1 %2147 }
 0xc93   : > { %v2153_v15 = vsel %vm2055_vm13, %v2148_v62, 0 }
 0xc94   : > { %v3650_v5 = vpop.eup %3649  ;;  %3415 = vmatpush3.bf16.msra.mxu0 %v2153_v15 }
 0xc95   : > { %v2043_v16 = vmul.f32 %v3650_v5, %v3642_v0  ;;  %3426 = vmatprep.subr.bf16.mxu0 %v3789_v19  ;;  %v3174_v5 = vld [vmem:[%s4026_s17 + $0x2] ss:$0 sm:$0xff] }
 0xc97   : > { %v2047_v18 = vpack.c.bf16 %v2043_v16, %v2043_v16 }
 0xc98   : > { %v3652_v20 = vpop.eup %3651 }
 0xc99   : > { %3411 = vmatmul.mubr.msk.bf16.vlgmr.msra.gmra.mxu1 %vm2001_vm12, %v2047_v18  ;;  %v2044_v22 = vmul.f32 %v3652_v20, %v3644_v2  ;;  %v3599_v2 = vld [vmem:[%s4052_s9 + $0x18] sm:$0xff]  }
 0xc9a   : > { %3421 = vmatpush3.bf16.msra.mxu1 %v2201_v21  ;;  %3422 = vmatprep.mubr.msk.bf16.mxu1 %vm3790_vm3, %v3789_v19 }
 0xc9b   : > { %v2048_v24 = vpack.c.bf16 %v2044_v22, %v2044_v22  ;;  %3434 = vmatprep.subr.bf16.mxu1 %v3789_v19 }
 0xc9c   : > { %v3654_v25 = vpop.eup %3653 }
 0xc9d   : > { %3417 = vmatmul.mubr.msk.bf16.vlgmr.msra.gmra.mxu0 %vm2001_vm12, %v2048_v24  ;;  %v2045_v26 = vmul.f32 %v3654_v25, %v3646_v4 }
 0xc9e   : > { %3430 = vmatprep.mubr.msk.bf16.mxu0 %vm3790_vm3, %v3789_v19  ;;  %3427 = vmatpush3.bf16.msra.mxu0 %v3595_v32  ;;  %v3604_v32 = vld [vmem:[%s4061_s13 + $0x50] sm:$0xff]  }
 0xc9f   : > { %v2049_v27 = vpack.c.bf16 %v2045_v26, %v2045_v26  ;;  %3428 = vmatprep.subr.bf16.mxu0 %v3789_v19  ;;  %v3601_v26 = vld [vmem:[%s4052_s9 + $0x8] sm:$0xff]  }
 0xca1   : > { %3423 = vmatmul.mubr.msk.bf16.vlgmr.msra.gmra.mxu1 %vm2001_vm12, %v2049_v27 }
 0xca2   : > { %3438 = vmatprep.mubr.msk.bf16.mxu1 %vm3790_vm3, %v3789_v19  ;;  %3429 = vmatpush3.bf16.msra.mxu0 %v3596_v11  ;;  %v3605_v11 = vld [vmem:[%s4061_s13 + $0x38] sm:$0xff]  }
 0xca3   : > { %3442 = vmatprep.subr.bf16.mxu0 %v3789_v19  ;;  %3435 = vmatpush3.bf16.msra.mxu1 %v3599_v2  ;;  %v3613_v2 = vld [vmem:[%s4061_s13 + $0x8] sm:$0xff]  }
 0xca4   : > { %3436 = vmatprep.subr.bf16.mxu1 %v3789_v19 }
 0xca7   : > { %3437 = vmatpush3.bf16.msra.mxu1 %v3600_v3 }
 0xca8   : > { %3450 = vmatprep.subr.bf16.mxu1 %v3789_v19 }
 0xcf5   : > { %v2093_v28 = vpop.f32.mrf.mxu0 }
 0xcf7   : > { %v3406_v29 = vpop.f32.mrf.mxu0 }
 0xcf9   : > { %v2096_v30 = vpop.f32.mrf.mxu0 }
 0xcfb   : > { %v3407_v31 = vpop.f32.mrf.mxu0 }
 0xcfc   : > { %v3603_v31 = vld [vmem:[%s4061_s13 + $0x58] sm:$0xff]  }
 0xd59   : > { %v2141_v33 = vpop.f32.mrf.mxu1 }
 0xd5a   : > { %2244 = vrot.lane.b32.xlu1 %v2141_v33, %s3796_s15  ;;  %v3606_v33 = vld [vmem:[%s4061_s13 + $0x48] sm:$0xff]  }
 0xd5b   : > { %v3412_v34 = vpop.f32.mrf.mxu1 }
 0xd5c   : > { %v3607_v34 = vld [vmem:[%s4061_s13 + $0x30] sm:$0xff]  }
 0xd5d   : > { %v2144_v35 = vpop.f32.mrf.mxu1  ;;  %v2189_v36 = vpop.f32.mrf.mxu0 }
 0xd5e   : > { %2248 = vrot.lane.b32.xlu0 %v2189_v36, %s3797_s4  ;;  %v3608_v35 = vld [vmem:[%s4061_s13 + $0x40] sm:$0xff]   ;;  %v3609_v36 = vld [vmem:[%s4061_s13 + $0x28] sm:$0xff]  }
 0xd5f   : > { %v3413_v37 = vpop.f32.mrf.mxu1  ;;  %v3418_v38 = vpop.f32.mrf.mxu0 }
 0xd60   : > { %v3610_v37 = vld [vmem:[%s4061_s13 + $0x20] sm:$0xff]  }
 0xd61   : > { %v2192_v39 = vpop.f32.mrf.mxu0  ;;  %v2237_v40 = vpop.f32.mrf.mxu1 }
 0xd62   : > { %2252 = vrot.lane.b32.xlu1 %v2237_v40, %s3798_s8 }
 0xd63   : > { %v3419_v44 = vpop.f32.mrf.mxu0  ;;  %v3424_v45 = vpop.f32.mrf.mxu1 }
 0xd65   : > { %v2240_v46 = vpop.f32.mrf.mxu1 }
 0xd67   : > { %v3425_v43 = vpop.f32.mrf.mxu1 }
 0xdcc   : > { %v2245_v41 = vpop.permute.xlu1 %2244 }
 0xdcd   : > { %v2255_v48 = vsel %vm1142_vm6, %v2093_v28, %v2245_v41  ;;  %v3602_v28 = vld [vmem:[%s4052_s9] sm:$0xff]  }
 0xdd0   : > { %v2249_v47 = vpop.permute.xlu0 %2248 }
 0xdd1   : > { %v2256_v49 = vsel %vm1587_vm8, %v2255_v48, %v2249_v47  ;;  %v3184_v48 = vld [vmem:[%s892_s16] ss:$0 sm:$0xff] }
 0xdd4   : > { %v2253_v50 = vpop.permute.xlu1 %2252 }
 0xdd5   : > { %v2257_v51 = vsel %vm1589_vm9, %v2256_v49, %v2253_v50 }
 0xdd6   : > { %v2258_v52 = vpack.c.bf16 %v2257_v51, %v2257_v51 }
 0xdd8   : > { %3431 = vmatmul.mubr.msk.bf16.vlgmr.msra.gmra.mxu0 %vm1039_vm2, %v2258_v52 }
 0xdd9   : > { %3446 = vmatprep.mubr.msk.bf16.mxu0 %vm3790_vm3, %v3789_v19  ;;  %3443 = vmatpush3.bf16.msra.mxu0 %v3597_v1  ;;  %v3612_v1 = vld [vmem:[%s4061_s13 + $0x10] sm:$0xff]  }
 0xdda   : > { %3444 = vmatprep.subr.bf16.mxu0 %v3789_v19 }
 0xe98   : > { %v2308_v53 = vpop.f32.mrf.mxu0 }
 0xe99   : > { %v4321_v54 = vadd.f32 %v2308_v53, %v4195_v23  ;;  %v3598_v23 = vld [vmem:[%s4052_s9 + $0x20] sm:$0xff]  }
 0xe9a   : > { %v3432_v55 = vpop.f32.mrf.mxu0  ;;  %3445 = vmatpush3.bf16.msra.mxu0 %v3598_v23  ;;  %v3614_v23 = vld [vmem:[%s4061_s13] sm:$0xff]  }
 0xe9b   : > { %v2323_v56 = vsel %vm1039_vm2, %v4321_v54, 0.0  ;;  %3458 = vmatprep.subr.bf16.mxu0 %v3789_v19 }
 0xe9c   : > { %2324 = vadd.xlane.f32.xlu0 %v2323_v56  ;;  %v2311_v58 = vpop.f32.mrf.mxu0 }
 0xe9e   : > { %v3433_v57 = vpop.f32.mrf.mxu0 }
 0xf25   : > { %v2325_v59 = vpop.xlane.xlu0 %2324 }
 0xf26   : > { %v2326_v60 = vmul.f32 0.03125, %v2325_v59 }
 0xf28   : > { %v2327_v61 = vsub.f32 %v4321_v54, %v2326_v60 }
 0xf2a   : > { %v2328_v63 = vmul.f32 %v2327_v61, %v2327_v61  ;;  %v2339_v62 = vmul.f32 %v3173_v14, %v2327_v61 }
 0xf2c   : > { %v2329_v0 = vsel %vm1039_vm2, %v2328_v63, 0.0  ;;  %v3611_v63 = vld [vmem:[%s4061_s13 + $0x18] sm:$0xff]   ;;  %s4585_s13 = sld [smem:[#allocation12_spill]] }
 0xf2d   : > { %2330 = vadd.xlane.f32.xlu1 %v2329_v0 }
 0xf32   : > { %p3201_p1 = scmp.ne.s32.totalorder %s4585_s13, 1 }
 0xf33   : > { %s4586_s10 = sld [smem:[#allocation41_spill]] (!%p3201_p1) }
 0xf34   : > { %s4587_s25 = sld [smem:[#allocation42_spill]] (!%p3201_p1) }
 0xfb6   : > { %v2331_v4 = vpop.xlane.xlu1 %2330 }
 0xfb7   : > { %v2332_v6 = vmul.f32 0.032258064, %v2331_v4 }
 0xfb9   : > { %3655 = vrsqrt.f32 %v2332_v6  ;;  %vm2342_vm14 = vcmp.eq.f32.partialorder %v2332_v6, inf  ;;  %v2345_v9 = vand.u32 2147483648, %v2332_v6  ;;  %vm2344_vm15 = vcmp.eq.f32.partialorder %v2332_v6, 0.0 }
 0xfc6   : > { %v3656_v7 = vpop.eup %3655 }
 0xfc7   : > { %v2341_v8 = vmul.f32 %v3656_v7, %v2332_v6 }
 0xfc9   : > { %v2343_v10 = vsel %vm2342_vm14, %v2332_v6, %v2341_v8 }
 0xfca   : > { %v2346_v12 = vsel %vm2344_vm15, %v2345_v9, %v2343_v10 }
 0xfcb   : > { %v2347_v13 = vadd.f32 1e-06, %v2346_v12 }
 0xfcd   : > { %3657 = vrcp.f32 %v2347_v13 }
 0xfda   : > { %v3658_v15 = vpop.eup %3657 }
 0xfdb   : > { %v2349_v16 = vmul.f32 %v3658_v15, %v2339_v62 }
 0xfdd   : > { %v2356_v17 = vadd.f32 %v3174_v5, %v2349_v16 }
 0xfdf   : > { %v2357_v18 = vpack.c.bf16 %v2356_v17, %v2356_v17 }
 0xfe1   : > { %3447 = vmatmul.mubr.msk.bf16.vlgmr.msra.gmra.mxu0 %vm1039_vm2, %v2357_v18  ;;  %v2359_v20 = vshrl.u32 %v2357_v18, 16  ;;  %v2362_v22 = vshll.u32 %v2357_v18, 16  ;;  %v2480_v29 = vrot.slane %v2357_v18, 7 }
 0xfe2   : > { %3466 = vmatprep.mubr.msk.bf16.mxu0 %vm3790_vm3, %v3789_v19  ;;  %3459 = vmatpush3.bf16.msra.mxu0 %v3605_v11 }
 0xfe3   : > { %v2361_v21 = vrot.slane %v2359_v20, 7  ;;  %v2484_v30 = vsel %vm2366_vm1, 0, %v2480_v29  ;;  %3460 = vmatprep.subr.bf16.mxu0 %v3789_v19 }
 0xfe5   : > { %v2364_v25 = vor.u32 %v2362_v22, %v2361_v21 }
 0xfe6   : > { %3461 = vmatpush3.bf16.msra.mxu0 %v3607_v34 }
 0xfe7   : > { %v2369_v27 = vsel %vm4341_vm4, 0, %v2364_v25  ;;  %3462 = vmatprep.subr.bf16.mxu0 %v3789_v19 }
 0xfe8   : > { %3439 = vmatmul.mubr.msk.bf16.vlgmr.msra.gmra.mxu1 %vm1039_vm2, %v2369_v27 }
 0xfe9   : > { %3451 = vmatpush3.bf16.msra.mxu1 %v3601_v26  ;;  %3454 = vmatprep.mubr.msk.bf16.mxu1 %vm3790_vm3, %v3789_v19 }
 0xfea   : > { %3452 = vmatprep.subr.bf16.mxu1 %v3789_v19  ;;  %3463 = vmatpush3.bf16.msra.mxu0 %v3609_v36 }
 0xfeb   : > { %3464 = vmatprep.subr.bf16.mxu0 %v3789_v19 }
 0xfed   : > { %3453 = vmatpush3.bf16.msra.mxu1 %v3602_v28 }
 0xfee   : > { %3470 = vmatprep.subr.bf16.mxu1 %v3789_v19  ;;  %3465 = vmatpush3.bf16.msra.mxu0 %v3610_v37 }
 0xfef   : > { %3482 = vmatprep.subr.bf16.mxu0 %v3789_v19 }
 0xff0   : > { %3455 = vmatmul.mubr.msk.bf16.vlgmr.msra.gmra.mxu1 %vm1039_vm2, %v2484_v30 }
 0xff1   : > { %3478 = vmatprep.mubr.msk.bf16.mxu1 %vm3790_vm3, %v3789_v19  ;;  %3471 = vmatpush3.bf16.msra.mxu1 %v3603_v31 }
 0xff2   : > { %3472 = vmatprep.subr.bf16.mxu1 %v3789_v19 }
 0xff5   : > { %3473 = vmatpush3.bf16.msra.mxu1 %v3604_v32 }
 0xff6   : > { %3474 = vmatprep.subr.bf16.mxu1 %v3789_v19 }
 0xff9   : > { %3475 = vmatpush3.bf16.msra.mxu1 %v3606_v33 }
 0xffa   : > { %3476 = vmatprep.subr.bf16.mxu1 %v3789_v19 }
 0xffd   : > { %3477 = vmatpush3.bf16.msra.mxu1 %v3608_v35 }
0x10a1   : > { %v2473_v38 = vpop.f32.mrf.mxu0 }
0x10a3   : > { %v3448_v39 = vpop.f32.mrf.mxu0 }
0x10a5   : > { %v2476_v40 = vpop.f32.mrf.mxu0 }
0x10a7   : > { %v3449_v44 = vpop.f32.mrf.mxu0 }
0x10a8   : > { %v2419_v45 = vpop.f32.mrf.mxu1 }
0x10a9   : > { %v2474_v47 = vadd.f32 %v2473_v38, %v2419_v45 }
0x10aa   : > { %v3440_v46 = vpop.f32.mrf.mxu1 }
0x10ac   : > { %v2422_v43 = vpop.f32.mrf.mxu1 }
0x10ae   : > { %v3441_v41 = vpop.f32.mrf.mxu1 }
0x10b0   : > { %v2533_v49 = vpop.f32.mrf.mxu1 }
0x10b1   : > { %v2539_v50 = vadd.f32 %v2533_v49, %v2474_v47 }
0x10b2   : > { %v3456_v51 = vpop.f32.mrf.mxu1 }
0x10b3   : > { %v2546_v52 = vadd.f32 %v3184_v48, %v2539_v50 }
0x10b4   : > { %v2536_v53 = vpop.f32.mrf.mxu1 }
0x10b5   : > { %v2547_v55 = vmax.f32 %v2546_v52, 0.0 }
0x10b6   : > { %v3457_v56 = vpop.f32.mrf.mxu1 }
0x10b7   : > { %v2548_v58 = vpack.c.bf16 %v2547_v55, %v2547_v55 }
0x10b9   : > { %3479 = vmatmul.mubr.msk.bf16.vlgmr.msra.gmra.mxu1 %vm2582_vm5, %v2548_v58  ;;  %v2550_v57 = vshrl.u32 %v2548_v58, 16  ;;  %v2553_v60 = vshll.u32 %v2548_v58, 16  ;;  %v2693_v3 = vrot.slane %v2548_v58, 7 }
0x10bb   : > { %v2552_v59 = vrot.slane %v2550_v57, 7  ;;  %v2695_v4 = vsel %vm2366_vm1, 0, %v2693_v3 }
0x10bd   : > { %v2555_v61 = vor.u32 %v2553_v60, %v2552_v59 }
0x10bf   : > { %v2557_v0 = vsel %vm4341_vm4, 0, %v2555_v61 }
0x10c0   : > { %3467 = vmatmul.mubr.msk.bf16.vlgmr.msra.gmra.mxu0 %vm2582_vm5, %v2557_v0 }
0x10c1   : > { %3483 = vmatpush3.bf16.msra.mxu0 %v3611_v63  ;;  %3490 = vmatprep.mubr.msk.bf16.mxu0 %vm3790_vm3, %v3789_v19 }
0x10c2   : > { %3484 = vmatprep.subr.bf16.mxu0 %v3789_v19 }
0x10c5   : > { %3485 = vmatpush3.bf16.msra.mxu0 %v3612_v1 }
0x10c6   : > { %3486 = vmatprep.subr.bf16.mxu0 %v3789_v19 }
0x10c9   : > { %3487 = vmatpush3.bf16.msra.mxu0 %v3613_v2 }
0x10ca   : > { %3488 = vmatprep.subr.bf16.mxu0 %v3789_v19  ;;  %v3200_v19 = vld [vmem:[%s900_s11] ss:$0 sm:$0xff] }
0x10cd   : > { %3489 = vmatpush3.bf16.msra.mxu0 %v3614_v23 }
0x10d0   : > { %3491 = vmatmul.mubr.msk.bf16.vlgmr.msra.gmra.mxu0 %vm2582_vm5, %v2695_v4 }
0x1179   : > { %v2686_v6 = vpop.f32.mrf.mxu1 }
0x117b   : > { %v3480_v7 = vpop.f32.mrf.mxu1 }
0x117d   : > { %v2689_v8 = vpop.f32.mrf.mxu1 }
0x117f   : > { %v3481_v9 = vpop.f32.mrf.mxu1 }
0x1180   : > { %v2620_v10 = vpop.f32.mrf.mxu0 }
0x1181   : > { %v2687_v62 = vadd.f32 %v2686_v6, %v2620_v10 }
0x1182   : > { %v3468_v12 = vpop.f32.mrf.mxu0 }
0x1184   : > { %v2623_v13 = vpop.f32.mrf.mxu0 }
0x1186   : > { %v3469_v14 = vpop.f32.mrf.mxu0 }
0x1190   : > { %v2756_v15 = vpop.f32.mrf.mxu0 }
0x1191   : > { %v2762_v5 = vadd.f32 %v2756_v15, %v2687_v62 }
0x1192   : > { %v3492_v16 = vpop.f32.mrf.mxu0 }
0x1193   : > { %v2769_v17 = vadd.f32 %v3200_v19, %v2762_v5 }
0x1194   : > { %v2759_v18 = vpop.f32.mrf.mxu0 }
0x1195   : > { %v2770_v20 = vmax.f32 %v2769_v17, 0.0  ;;  %2776 = sbr.rel (%p3201_p1) target bundleno = 4832 (0x12e0), region = 104 }
0x1196   : > { %v3493_v21 = vpop.f32.mrf.mxu0 }
0x1197   : > { %v2771_v22 = vadd.f32 %v2770_v20, %v4321_v54 }
0x1199   : > { %2772 = vst.msk [vmem:[#allocation2] sm:$0xff] %vm1039_vm2, %v2771_v22 }
0x119a   : > { %v2779_v24 = vsel %vm1039_vm2, %v2771_v22, 0.0  ;;  %v2815_v30 = vsel %vm2001_vm12, %v4273_v42, 0.0  ;;  %v3202_v37 = vld [vmem:[%s4586_s10] ss:$0 sm:$0xff] }
0x119b   : > { %2780 = vadd.xlane.f32.xlu0 %v2779_v24  ;;  %2816 = vst [vmem:[%s4065_s12] sm:$0xff] %v2815_v30  ;;  %v3203_v39 = vld [vmem:[%s4587_s25] ss:$0 sm:$0xff] }
0x1224   : > { %v2781_v25 = vpop.xlane.xlu0 %2780 }
0x1225   : > { %v2782_v26 = vmul.f32 0.03125, %v2781_v25 }
0x1227   : > { %v2783_v27 = vsub.f32 %v2771_v22, %v2782_v26 }
0x1229   : > { %v2784_v28 = vmul.f32 %v2783_v27, %v2783_v27  ;;  %v2795_v38 = vmul.f32 %v3202_v37, %v2783_v27 }
0x122b   : > { %v2785_v29 = vsel %vm1039_vm2, %v2784_v28, 0.0 }
0x122c   : > { %2786 = vadd.xlane.f32.xlu0 %v2785_v29 }
0x12b5   : > { %v2787_v54 = vpop.xlane.xlu0 %2786 }
0x12b6   : > { %v2788_v31 = vmul.f32 0.032258064, %v2787_v54 }
0x12b8   : > { %3659 = vrsqrt.f32 %v2788_v31  ;;  %vm2798_vm3 = vcmp.eq.f32.partialorder %v2788_v31, inf  ;;  %v2801_v33 = vand.u32 2147483648, %v2788_v31  ;;  %vm2800_vm6 = vcmp.eq.f32.partialorder %v2788_v31, 0.0 }
0x12c5   : > { %v3660_v32 = vpop.eup %3659 }
0x12c6   : > { %v2797_v11 = vmul.f32 %v3660_v32, %v2788_v31 }
0x12c8   : > { %v2799_v34 = vsel %vm2798_vm3, %v2788_v31, %v2797_v11 }
0x12c9   : > { %v2802_v35 = vsel %vm2800_vm6, %v2801_v33, %v2799_v34 }
0x12ca   : > { %v2803_v36 = vadd.f32 1e-06, %v2802_v35 }
0x12cc   : > { %3661 = vrcp.f32 %v2803_v36 }
0x12d9   : > { %v3662_v42 = vpop.eup %3661 }
0x12da   : > { %v2805_v40 = vmul.f32 %v3662_v42, %v2795_v38 }
0x12dc   : > { %v2812_v44 = vadd.f32 %v3203_v39, %v2805_v40 }
0x12de   : > { %v2813_v45 = vsel %vm1039_vm2, %v2812_v44, 0.0 }
0x12df   : > { %2814 = vst [vmem:[%s4063_s20] sm:$0xff] %v2813_v45 }
0x12e0 PF: > { %s4588_s3 = sld [smem:[#allocation13_spill]]  ;;  %s2836_s8 = sshll.u32 %s4063_s20, 4  ;;  %s2837_s8 = int_to_ptr.vmem [resolvable:$true] %s2836_s8 }
0x12e1   : > { %s4589_s22 = sld [smem:[#allocation22_spill]]  ;;  %s3663_s19 = scalar_lea.vmem %s2837_s8, 128 }
0x12e2   : > { %s4591_s15 = sld [smem:[#allocation43_spill]]  ;;  %p3664_p2 = scmp.ne.s32.totalorder %s2837_s8, %s3663_s19 }
0x12e3   : > { %s3799_s26 = smov [#allocation3]  }
0x12e4   : > { %p3665_p4 = pnand %p3664_p2, %p3955_p3  ;;  %s3667_s6 = sshll.u32 %s3799_s26, 4  ;;  %s3668_s6 = int_to_ptr.vmem [resolvable:$false] %s3667_s6 }
0x12e5   : > { %s3669_s28 = scalar_lea.vmem %s3668_s6, 256  ;;  %p3670_p6 = scmp.lt.s32.totalorder %s2837_s8, %s3668_s6 }
0x12e6   : > { %s3206_s5 = sshll.u32 %s4588_s3, 7  ;;  %p3666_p5 = pneg %p3665_p4 }
0x12e7   : > { %s2818_s29 = scalar_lea.sflag [#allocation4], %s4589_s22  ;;  %p3671_p7 = scmp.lt.s32.totalorder %s3669_s28, %s3663_s19 }
0x12e8   : > { %s2834_s4 = scalar_lea.hbm %s4591_s15, %s3206_s5 }
0x12e9   : > { %p3672_p8 = por %p3671_p7, %p3670_p6 }
0x12eb   : > { %p3673_p10 = pnand %p3672_p8, %p3666_p5 }
0x12ed   : > { %3676 = shalt.err (!%p3673_p10)
}
0x12ee   : > { %s3677_s7 = scalar_lea.hbm %s2834_s4, 128  ;;  %s3681_s2 = scalar_lea.hbm %s4591_s15, 256 }
0x12ef   : > { %p3678_p11 = scmp.ne.s32.totalorder %s2834_s4, %s3677_s7  ;;  %p3682_p0 = scmp.lt.s32.totalorder %s2834_s4, %s4591_s15 }
0x12f0   : > { %p3683_p1 = scmp.lt.s32.totalorder %s3681_s2, %s3677_s7 }
0x12f1   : > { %p3679_p12 = pnand %p3678_p11, %p3955_p3 }
0x12f2   : > { %p3684_p2 = por %p3683_p1, %p3682_p0 }
0x12f3   : > { %p3680_p13 = pneg %p3679_p12 }
0x12f5   : > { %p3685_p4 = pnand %p3684_p2, %p3680_p13 }
0x12f7   : > { %3688 = shalt.err (!%p3685_p4)
}
0x12f8   : > { %3497 = dma.vmem_to_hbm [thread:$0]  (%p3955_p3), %s2837_s8, 128, %s2834_s4, %s2818_s29  }
0x12f9   : > { %s4592_s11 = sld [smem:[#allocation44_spill]]  ;;  %s2849_s10 = sshll.u32 %s4065_s12, 4  ;;  %s2850_s10 = int_to_ptr.vmem [resolvable:$true] %s2849_s10 }
0x12fa   : > { %s2823_s24 = scalar_lea.sflag [#allocation6], %s4589_s22  ;;  %s3689_s1 = scalar_lea.vmem %s2850_s10, 128 }
0x12fb   : > { %p3690_p5 = scmp.ne.s32.totalorder %s2850_s10, %s3689_s1  ;;  %s3800_s25 = smov [#allocation5]  }
0x12fc   : > { %s3693_s27 = sshll.u32 %s3800_s25, 4  ;;  %s3694_s27 = int_to_ptr.vmem [resolvable:$false] %s3693_s27 }
0x12fd   : > { %p3691_p6 = pnand %p3690_p5, %p3955_p3  ;;  %s3695_s18 = scalar_lea.vmem %s3694_s27, 256 }
0x12fe   : > { %p3696_p8 = scmp.lt.s32.totalorder %s2850_s10, %s3694_s27  ;;  %p3697_p10 = scmp.lt.s32.totalorder %s3695_s18, %s3689_s1 }
0x12ff   : > { %s2847_s21 = scalar_lea.hbm %s4592_s11, %s3206_s5  ;;  %p3692_p7 = pneg %p3691_p6 }
0x1300   : > { %p3698_p11 = por %p3697_p10, %p3696_p8 }
0x1302   : > { %p3699_p12 = pnand %p3698_p11, %p3692_p7 }
0x1304   : > { %3702 = shalt.err (!%p3699_p12)
}
0x1305   : > { %s3703_s3 = scalar_lea.hbm %s2847_s21, 128  ;;  %s3707_s5 = scalar_lea.hbm %s4592_s11, 256 }
0x1306   : > { %p3704_p13 = scmp.ne.s32.totalorder %s2847_s21, %s3703_s3  ;;  %p3708_p2 = scmp.lt.s32.totalorder %s2847_s21, %s4592_s11 }
0x1307   : > { %p3709_p4 = scmp.lt.s32.totalorder %s3707_s5, %s3703_s3 }
0x1308   : > { %p3705_p0 = pnand %p3704_p13, %p3955_p3 }
0x1309   : > { %p3710_p5 = por %p3709_p4, %p3708_p2 }
0x130a   : > { %p3706_p1 = pneg %p3705_p0 }
0x130c   : > { %p3711_p6 = pnand %p3710_p5, %p3706_p1 }
0x130e   : > { %3714 = shalt.err (!%p3711_p6)
}
0x130f   : > { %3498 = dma.vmem_to_hbm [thread:$0]  (%p3955_p3), %s2850_s10, 128, %s2847_s21, %s2823_s24  }
0x1310 PF: > { %s4593_s29 = sld [smem:[#allocation16_spill]] }
0x1311   : > { %s4594_s19 = sld [smem:[#allocation9_spill]] }
0x1316   : > { %p3508_p7 = scmp.ge.s32.totalorder %s4593_s29, 2 }
0x1317   : > { %s2861_s6 = sand.u32 1, %s4594_s19  }
0x1318   : > { %p3502_p8 = pnand %p3508_p7, %p3965_p9  ;;  %s2862_s28 = scalar_lea.sflag [#allocation4], %s2861_s6 }
0x131a   : > { %p3503_p10 = pneg %p3502_p8 }
0x131c   : > { %3748 = dma.done.wait (%p3503_p10), %s2862_s28, 128  }
0x131d   : > { %3750 = vsyncadd (%p3503_p10), %s2862_s28, 4294967168  ;;  %s2871_s7 = scalar_lea.sflag [#allocation6], %s2861_s6 }
0x131e   : > { %3752 = dma.done.wait (%p3503_p10), %s2871_s7, 128  }
0x131f   : > { %3754 = vsyncadd (%p3503_p10), %s2871_s7, 4294967168  ;;  %s37_s26 = sadd.s32 1, %s4593_s29   ;;  %s4596_s1 = sld [smem:[#allocation10_spill]] }
0x1320   : > { %p34_p11 = scmp.ge.s32.totalorder %s37_s26, 6   ;;  %s4597_s22 = sld [smem:[#allocation11_spill]] }
0x1321   : > { %s4598_s23 = sld [smem:[#allocation21_spill]] }
0x1322   : > { %s4599_s24 = sld [smem:[#allocation14_spill]]  ;;  %36 = sbr.rel (!%p34_p11) target bundleno = 28 (0x1c), region = 198 }
0x1323   : > { %s4600_s2 = sld [smem:[#allocation15_spill]] }
0x1324   : > { %s4601_s25 = sld [smem:[#allocation17_spill]] }
0x1325   : > { %s4602_s3 = sld [smem:[#allocation19_spill]] }
0x1327   :  { %2876 = vsyncpa [#allocation4], 1 }
0x1328   :  { %2878 = vsyncpa [#allocation4 + $0x1], 1 }
0x1329   :  { %2879 = vsyncpa [#allocation6], 1 }
0x132a   :  { %2881 = vsyncpa [#allocation6 + $0x1], 1 }

</bundles_post_ra>
